<compile_context>
chip_gen: v7x
topology: tpu7x:2x2x1
jax: 0.10.0
libtpu: 0.0.40
codegen_flags: <defaults>
</compile_context>

<pallas_src>
import functools

import jax
import jax.numpy as jnp
import numpy as np
from jax.experimental import pallas as pl
from jax.experimental.pallas import tpu as pltpu

LANES = 128          # channel slab width (lane axis)
ATTN_HIDDEN = 128    # attention_net hidden size (fixed by the module)


def _round_up(x, m):
    return (x + m - 1) // m * m


# ----------------------------------------------------------------------------
# Fused forward kernel: whole network for one batch BLOCK per grid step.
# ----------------------------------------------------------------------------
def fused_tcn_kernel(x_ref, w0a_ref, w0b_ref, s0_ref, t0_ref,
                     w1_ref, s1_ref, t1_ref, bd_ref,
                     w1h_ref, b1h_ref, w2h_ref, wo_ref, bo_ref,
                     o_ref, xpad_ref, *,
                     T, Kmax, dilations, has_downsample, pad_rows, Bblk):
    C = x_ref.shape[-1]                                   # 128 (padded channels)
    M = Bblk * T                                          # stacked rows per step

    # Zero ONLY the causal-pad rows (they are never written by the kernel).
    # Done every step so it stays correct if the grid is split across cores.
    xpad_ref[:, 0:pad_rows, :] = jnp.zeros((Bblk, pad_rows, C), xpad_ref.dtype)

    h = x_ref[...].reshape(M, C)                          # (M, C) f32, pad lanes 0

    def taps_of(act, d):
        # Per-element causal pad via the VMEM scratch; all offsets static.
        xpad_ref[:, pad_rows:pad_rows + T, :] = act.reshape(Bblk, T, C)
        taps = []
        for j in range(Kmax):
            start = pad_rows - (Kmax - 1 - j) * d         # static python int >= 0
            taps.append(xpad_ref[:, start:start + T, :]
                        .reshape(M, C).astype(jnp.bfloat16))
        return taps

    def dot32(a, b):
        return jnp.dot(a, b, preferred_element_type=jnp.float32)

    for l, d in enumerate(dilations):                     # static unroll over levels
        # ---- branch0: multi-kernel causal conv (per-tap matmul accumulation)
        #      with the 1x1 downsample fused into the last (unshifted) tap ----
        taps = taps_of(h, d)
        acc0 = dot32(taps[0], w0a_ref[l, 0:C, :])
        for j in range(1, Kmax - 1):
            acc0 = acc0 + dot32(taps[j], w0a_ref[l, j * C:(j + 1) * C, :])
        if has_downsample[l]:
            last = dot32(taps[Kmax - 1], w0b_ref[l])      # (M, 2C): [conv | downsample]
            acc0 = acc0 + last[:, :C]
            res = last[:, C:] + bd_ref[l]
        else:
            acc0 = acc0 + dot32(taps[Kmax - 1], w0b_ref[l, :, :C])
            res = h
        # BatchNorm(eval) with the conv bias folded into the shift; then ReLU.
        out0 = jnp.maximum(acc0 * s0_ref[l] + t0_ref[l], 0.0)
        # dropout0: identity (eval mode)

        # ---- branch1: multi-kernel causal conv ----
        taps1 = taps_of(out0, d)
        acc1 = dot32(taps1[0], w1_ref[l, 0:C, :])
        for j in range(1, Kmax):
            acc1 = acc1 + dot32(taps1[j], w1_ref[l, j * C:(j + 1) * C, :])
        out1 = jnp.maximum(acc1 * s1_ref[l] + t1_ref[l], 0.0)
        # dropout1: identity (eval mode)

        h = jnp.maximum(out1 + res, 0.0)                  # residual add + ReLU

    # ---- attention head (softmax over each element's T time steps) ----
    a = jnp.tanh(dot32(h.astype(jnp.bfloat16), w1h_ref[...]) + b1h_ref[...])  # (M,128)
    # score_t = a_t . w2  -> VPU multiply + lane reduce (no N=1 MXU matmul).
    # (the second attention bias b2 is constant over time -> softmax-invariant)
    s3 = jnp.sum(a.reshape(Bblk, T, ATTN_HIDDEN) * w2h_ref[...],
                 axis=-1, keepdims=True)                                       # (Bblk,T,1)
    s3 = s3 - jnp.max(s3, axis=1, keepdims=True)
    e = jnp.exp(s3)
    wsm = e / jnp.sum(e, axis=1, keepdims=True)                                # softmax
    ctx = jnp.sum(h.reshape(Bblk, T, C) * wsm, axis=1)                         # (Bblk, C)
    logits = dot32(ctx.astype(jnp.bfloat16), wo_ref[...]) + bo_ref[...]        # (Bblk,128)
    o_ref[...] = logits.astype(o_ref.dtype)


# ----------------------------------------------------------------------------
# Wrapper: one pallas_call over batch blocks.
# ----------------------------------------------------------------------------
def fused_forward(x, prep, *, num_classes):
    B, T, cin_raw = x.shape
    C = LANES
    Kmax = prep["Kmax"]
    dilations = prep["dilations"]
    has_downsample = prep["has_downsample"]
    L = len(dilations)
    pad_rows = _round_up(max((Kmax - 1) * d for d in dilations), 8)

    # Batch blocking: fill the MXU M dimension (target Bblk*T >= 256 rows).
    Bblk = max(1, min(B, max(1, 256 // T)))
    nblk = (B + Bblk - 1) // Bblk
    B_pad = nblk * Bblk

    # one-time lane pad of the network input (cin -> 128 channels) + batch pad
    xp = jnp.zeros((B_pad, T, C), jnp.float32).at[:B, :, :cin_raw].set(x)

    kernel = functools.partial(
        fused_tcn_kernel, T=T, Kmax=Kmax, dilations=dilations,
        has_downsample=has_downsample, pad_rows=pad_rows, Bblk=Bblk)

    def c3(shape):
        return pl.BlockSpec(shape, lambda i: (0, 0, 0))

    def c2(shape):
        return pl.BlockSpec(shape, lambda i: (0, 0))

    in_specs = [
        pl.BlockSpec((Bblk, T, C), lambda i: (i, 0, 0)),          # x (batch block)
        c3((L, (Kmax - 1) * C, C)),                                # branch0 taps 0..Kmax-2
        c3((L, C, 2 * C)),                                         # branch0 last tap | downsample
        c3((L, 1, C)), c3((L, 1, C)),                              # branch0 BN scale, shift
        c3((L, Kmax * C, C)), c3((L, 1, C)), c3((L, 1, C)),        # branch1 W, scale, shift
        c3((L, 1, C)),                                             # downsample bias
        c2((C, ATTN_HIDDEN)), c2((1, ATTN_HIDDEN)),                # attention Linear 1
        c2((1, ATTN_HIDDEN)),                                      # attention Linear 2 (row vec)
        c2((C, LANES)), c2((1, LANES)),                            # output Linear (padded to 128)
    ]
    out_specs = pl.BlockSpec((Bblk, LANES), lambda i: (i, 0))

    args = (xp, prep["w0a"], prep["w0b"], prep["s0"], prep["t0"],
            prep["w1"], prep["s1"], prep["t1"], prep["bd"],
            prep["w1h"], prep["b1h"], prep["w2h"], prep["wo"], prep["bo"])

    M = Bblk * T
    conv_flops = 0
    for l in range(L):
        n_last = 2 * C if has_downsample[l] else C
        conv_flops += 2 * M * C * (C * (Kmax - 1) + n_last) + 2 * M * C * C * Kmax
    attn_flops = 2 * M * C * ATTN_HIDDEN + 2 * M * ATTN_HIDDEN + 2 * Bblk * C * LANES
    flops = int(nblk * (conv_flops + attn_flops))
    transcendentals = int(nblk * (M * ATTN_HIDDEN + M))
    bytes_accessed = int(sum(int(a.size) * a.dtype.itemsize for a in args)
                         + B_pad * LANES * 4)

    out = pl.pallas_call(
        kernel,
        out_shape=jax.ShapeDtypeStruct((B_pad, LANES), jnp.float32),
        grid=(nblk,),
        in_specs=in_specs,
        out_specs=out_specs,
        scratch_shapes=[pltpu.VMEM((Bblk, pad_rows + T, C), jnp.float32)],
        compiler_params=pltpu.CompilerParams(
            dimension_semantics=("parallel",),
            # Explicit scoped-VMEM budget; actual footprint is a few MiB, well
            # inside v7x's 64 MiB physical VMEM.
            vmem_limit_bytes=32 * 1024 * 1024),
        cost_estimate=pl.CostEstimate(flops=flops,
                                      transcendentals=transcendentals,
                                      bytes_accessed=bytes_accessed),
    )(*args)
    return out[:B, :num_classes]


def multiscale_multibranch_tcn_forward(x, lengths, prep, *, num_classes):
    """x: (B, T, input_size); lengths unused (matches the PyTorch forward)."""
    del lengths
    return fused_forward(x, prep, num_classes=num_classes)


# ----------------------------------------------------------------------------
# Raw parameters (mirroring the PyTorch module structure)
# ----------------------------------------------------------------------------
def _init_branch(key, cin, cb, K):
    kw, kb, kg, kbe = jax.random.split(key, 4)
    return dict(
        w=jax.random.normal(kw, (K, cin, cb), jnp.float32) / np.sqrt(cin * K),
        bias=0.01 * jax.random.normal(kb, (cb,), jnp.float32),
        gamma=1.0 + 0.1 * jax.random.normal(kg, (cb,), jnp.float32),
        beta=0.1 * jax.random.normal(kbe, (cb,), jnp.float32),
        mean=jnp.zeros((cb,), jnp.float32),      # BatchNorm1d running stats (eval)
        var=jnp.ones((cb,), jnp.float32),
    )


def _init_linear(key, fan_in, fan_out):
    k1, k2 = jax.random.split(key)
    return (jax.random.normal(k1, (fan_in, fan_out), jnp.float32) / np.sqrt(fan_in),
            0.01 * jax.random.normal(k2, (fan_out,), jnp.float32))


def init_params(key, input_size, num_channels, num_classes, kernel_sizes):
    nk = len(kernel_sizes)
    params = {"blocks": []}
    for lvl, cout in enumerate(num_channels):
        assert cout % nk == 0
        cin = input_size if lvl == 0 else num_channels[lvl - 1]
        cb = cout // nk
        key, k0, k1, kd = jax.random.split(key, 4)
        branch0 = [_init_branch(jax.random.fold_in(k0, i), cin, cb, k)
                   for i, k in enumerate(kernel_sizes)]
        branch1 = [_init_branch(jax.random.fold_in(k1, i), cout, cb, k)
                   for i, k in enumerate(kernel_sizes)]
        # Mirrors the PyTorch MultibranchTemporalBlock downsample condition.
        # TODO(synk): verify the (cin // num_kernels) != cout quirk is intended
        #             (vs. plain cin != cout) in the upstream module.
        if (cin // nk) != cout:
            wd, bd = _init_linear(kd, cin, cout)
            downsample = dict(w=wd, b=bd)
        else:
            downsample = None
        params["blocks"].append(dict(branch0=branch0, branch1=branch1,
                                     downsample=downsample))
    key, ka1, ka2, ko = jax.random.split(key, 4)
    c_last = num_channels[-1]
    w1, b1 = _init_linear(ka1, c_last, ATTN_HIDDEN)
    w2, b2 = _init_linear(ka2, ATTN_HIDDEN, 1)
    wo, bo = _init_linear(ko, c_last, num_classes)
    params["head"] = dict(w1=w1, b1=b1, w2=w2, b2=b2, wo=wo, bo=bo)
    return params


# ----------------------------------------------------------------------------
# Parameter preparation: pad channels to 128 lanes, merge multi-kernel
# branches per tap (zero leading taps for shorter kernels), fold conv bias +
# BN running stats into (scale, shift), fuse the 1x1 downsample into the last
# tap's weight slab (N=256), cast matmul weights to bf16, stack per level.
# ----------------------------------------------------------------------------
def prepare_params(raw, *, input_size, num_channels, kernel_sizes, num_classes):
    C = LANES
    Kmax = max(kernel_sizes)
    nk = len(kernel_sizes)
    L = len(num_channels)
    eps = 1e-5
    assert Kmax >= 2
    assert raw["head"]["w1"].shape[1] == ATTN_HIDDEN
    assert num_classes <= LANES and max(num_channels) <= C and input_size <= C

    w0a_l, w0b_l, s0_l, t0_l = [], [], [], []
    w1_l, s1_l, t1_l, bd_l, has_ds = [], [], [], [], []

    def combine(branches, cin_g, cout):
        cb = cout // nk
        W = np.zeros((Kmax, C, C), np.float32)
        S = np.zeros((1, C), np.float32)
        Sh = np.zeros((1, C), np.float32)
        for i, br in enumerate(branches):
            K = br["w"].shape[0]
            scale = np.asarray(br["gamma"]) / np.sqrt(np.asarray(br["var"]) + eps)
            shift = (np.asarray(br["beta"]) - np.asarray(br["mean"]) * scale
                     + np.asarray(br["bias"]) * scale)    # conv bias folded in
            W[Kmax - K:, :cin_g, i * cb:(i + 1) * cb] = np.asarray(br["w"])
            S[0, i * cb:(i + 1) * cb] = scale
            Sh[0, i * cb:(i + 1) * cb] = shift
        return W, S, Sh

    for l in range(L):
        blk = raw["blocks"][l]
        cin = input_size if l == 0 else num_channels[l - 1]
        cout = num_channels[l]

        W0, S0, T0 = combine(blk["branch0"], cin, cout)
        W1, S1, T1 = combine(blk["branch1"], cout, cout)

        Wd = np.zeros((C, C), np.float32)
        Bd = np.zeros((1, C), np.float32)
        if blk["downsample"] is not None:
            Wd[:cin, :cout] = np.asarray(blk["downsample"]["w"])
            Bd[0, :cout] = np.asarray(blk["downsample"]["b"])
            has_ds.append(True)
        else:
            has_ds.append(False)

        # taps 0..Kmax-2 as one (Kmax-1)*C x C slab; the last (unshifted) tap
        # gets the downsample weights appended along output columns (C x 2C).
        w0a_l.append(W0[:Kmax - 1].reshape((Kmax - 1) * C, C))
        w0b_l.append(np.concatenate([W0[Kmax - 1], Wd], axis=1))
        s0_l.append(S0); t0_l.append(T0)
        w1_l.append(W1.reshape(Kmax * C, C))
        s1_l.append(S1); t1_l.append(T1)
        bd_l.append(Bd)

    hd = raw["head"]
    c_last = num_channels[-1]
    W1h = np.zeros((C, ATTN_HIDDEN), np.float32)
    W1h[:c_last, :] = np.asarray(hd["w1"])
    B1h = np.asarray(hd["b1"], np.float32).reshape(1, ATTN_HIDDEN)
    W2h = np.asarray(hd["w2"], np.float32)[:, 0].reshape(1, ATTN_HIDDEN)
    # NOTE: hd["b2"] (scalar added to every time step's score) is dropped —
    #       softmax is shift-invariant so it does not change the output.
    Wo = np.zeros((C, LANES), np.float32)
    Wo[:c_last, :num_classes] = np.asarray(hd["wo"])
    Bo = np.zeros((1, LANES), np.float32)
    Bo[0, :num_classes] = np.asarray(hd["bo"])

    return dict(
        Kmax=Kmax,
        dilations=tuple(2 ** l for l in range(L)),
        has_downsample=tuple(has_ds),
        w0a=jnp.asarray(np.stack(w0a_l)).astype(jnp.bfloat16),
        w0b=jnp.asarray(np.stack(w0b_l)).astype(jnp.bfloat16),
        s0=jnp.asarray(np.stack(s0_l)), t0=jnp.asarray(np.stack(t0_l)),
        w1=jnp.asarray(np.stack(w1_l)).astype(jnp.bfloat16),
        s1=jnp.asarray(np.stack(s1_l)), t1=jnp.asarray(np.stack(t1_l)),
        bd=jnp.asarray(np.stack(bd_l)),
        w1h=jnp.asarray(W1h).astype(jnp.bfloat16), b1h=jnp.asarray(B1h),
        w2h=jnp.asarray(W2h),
        wo=jnp.asarray(Wo).astype(jnp.bfloat16), bo=jnp.asarray(Bo),
    )


# ----------------------------------------------------------------------------
# Pure-JAX reference (same math, same bf16-rounded matmul inputs as the kernel)
# ----------------------------------------------------------------------------
def _rt_bf16(a):
    return a.astype(jnp.bfloat16).astype(jnp.float32)


def _branch_ref(x, br, d):
    K = br["w"].shape[0]
    pad = (K - 1) * d
    T = x.shape[1]
    xp = jnp.pad(x, ((0, 0), (pad, 0), (0, 0)))
    acc = 0.0
    for j in range(K):
        acc = acc + jnp.einsum("btc,cd->btd",
                               _rt_bf16(xp[:, j * d:j * d + T, :]),
                               _rt_bf16(br["w"][j]),
                               precision=jax.lax.Precision.HIGHEST)
    scale = br["gamma"] / jnp.sqrt(br["var"] + 1e-5)
    shift = br["beta"] - br["mean"] * scale
    return jnp.maximum((acc + br["bias"]) * scale + shift, 0.0)


def forward_ref(x, raw):
    h = x
    for l, blk in enumerate(raw["blocks"]):
        d = 2 ** l
        out0 = jnp.concatenate([_branch_ref(h, br, d) for br in blk["branch0"]], -1)
        out1 = jnp.concatenate([_branch_ref(out0, br, d) for br in blk["branch1"]], -1)
        if blk["downsample"] is None:
            res = h
        else:
            res = jnp.einsum("btc,cd->btd", _rt_bf16(h),
                             _rt_bf16(blk["downsample"]["w"]),
                             precision=jax.lax.Precision.HIGHEST) + blk["downsample"]["b"]
        h = jnp.maximum(out1 + res, 0.0)
    hp = raw["head"]
    a = jnp.tanh(jnp.einsum("btc,ch->bth", _rt_bf16(h), _rt_bf16(hp["w1"]),
                            precision=jax.lax.Precision.HIGHEST) + hp["b1"])
    s = jnp.einsum("bth,ho->bto", a, hp["w2"],
                   precision=jax.lax.Precision.HIGHEST) + hp["b2"]
    w = jax.nn.softmax(s, axis=1)
    ctx = jnp.sum(h * w, axis=1)
    return jnp.einsum("bc,cn->bn", _rt_bf16(ctx), _rt_bf16(hp["wo"]),
                      precision=jax.lax.Precision.HIGHEST) + hp["bo"]


# ----------------------------------------------------------------------------
# Main
# ----------------------------------------------------------------------------
if __name__ == "__main__":
    B, T = 2, 8
    input_size = 32
    num_channels = [48, 48]
    num_classes = 10
    kernel_sizes = [3, 5]            # tcn_options['kernel_size']

    key = jax.random.PRNGKey(0)
    key, kx, kp = jax.random.split(key, 3)
    x = jax.random.normal(kx, (B, T, input_size), jnp.float32)
    lengths = jnp.full((B,), T, jnp.int32)   # unused, matches module signature

    raw = init_params(kp, input_size, num_channels, num_classes, kernel_sizes)
    prep = prepare_params(raw, input_size=input_size, num_channels=num_channels,
                          kernel_sizes=kernel_sizes, num_classes=num_classes)

    out = multiscale_multibranch_tcn_forward(x, lengths, prep,
                                             num_classes=num_classes)
    out = jax.block_until_ready(out)

    ref = jax.block_until_ready(forward_ref(x, raw))
    np.testing.assert_allclose(np.asarray(out), np.asarray(ref),
                               rtol=1e-2, atol=1e-2)
    assert out.shape == (B, num_classes)

    print("KERNEL_OK")
</pallas_src>

<mosaic_0001>
module attributes {stable_mosaic.version = 11 : i64} {
  func.func @fused_tcn_kernel(%arg0: i32, %arg1: memref<2x8x128xf32, #tpu.memory_space<vmem>>, %arg2: memref<2x512x128xbf16, #tpu.memory_space<vmem>>, %arg3: memref<2x128x256xbf16, #tpu.memory_space<vmem>>, %arg4: memref<2x1x128xf32, #tpu.memory_space<vmem>>, %arg5: memref<2x1x128xf32, #tpu.memory_space<vmem>>, %arg6: memref<2x640x128xbf16, #tpu.memory_space<vmem>>, %arg7: memref<2x1x128xf32, #tpu.memory_space<vmem>>, %arg8: memref<2x1x128xf32, #tpu.memory_space<vmem>>, %arg9: memref<2x1x128xf32, #tpu.memory_space<vmem>>, %arg10: memref<128x128xbf16, #tpu.memory_space<vmem>>, %arg11: memref<1x128xf32, #tpu.memory_space<vmem>>, %arg12: memref<1x128xf32, #tpu.memory_space<vmem>>, %arg13: memref<128x128xbf16, #tpu.memory_space<vmem>>, %arg14: memref<1x128xf32, #tpu.memory_space<vmem>>, %arg15: memref<2x128xf32, #tpu.memory_space<vmem>>, %arg16: memref<2x16x128xf32, #tpu.memory_space<vmem>>) attributes {dimension_semantics = [#tpu.dimension_semantics<parallel>], iteration_bounds = array<i64: 1>, scalar_prefetch = 0 : i64, scratch_operands = 1 : i64, tpu.core_type = #tpu.core_type<tc>, window_params = [{transform_indices = @transform_0, window_bounds = array<i64: 2, 8, 128>}, {pipeline_mode = #tpu.pipeline_mode<synchronous>, transform_indices = @transform_1, window_bounds = array<i64: 2, 512, 128>}, {pipeline_mode = #tpu.pipeline_mode<synchronous>, transform_indices = @transform_2, window_bounds = array<i64: 2, 128, 256>}, {pipeline_mode = #tpu.pipeline_mode<synchronous>, transform_indices = @transform_3, window_bounds = array<i64: 2, 1, 128>}, {pipeline_mode = #tpu.pipeline_mode<synchronous>, transform_indices = @transform_4, window_bounds = array<i64: 2, 1, 128>}, {pipeline_mode = #tpu.pipeline_mode<synchronous>, transform_indices = @transform_5, window_bounds = array<i64: 2, 640, 128>}, {pipeline_mode = #tpu.pipeline_mode<synchronous>, transform_indices = @transform_6, window_bounds = array<i64: 2, 1, 128>}, {pipeline_mode = #tpu.pipeline_mode<synchronous>, transform_indices = @transform_7, window_bounds = array<i64: 2, 1, 128>}, {pipeline_mode = #tpu.pipeline_mode<synchronous>, transform_indices = @transform_8, window_bounds = array<i64: 2, 1, 128>}, {pipeline_mode = #tpu.pipeline_mode<synchronous>, transform_indices = @transform_9, window_bounds = array<i64: 128, 128>}, {pipeline_mode = #tpu.pipeline_mode<synchronous>, transform_indices = @transform_10, window_bounds = array<i64: 1, 128>}, {pipeline_mode = #tpu.pipeline_mode<synchronous>, transform_indices = @transform_11, window_bounds = array<i64: 1, 128>}, {pipeline_mode = #tpu.pipeline_mode<synchronous>, transform_indices = @transform_12, window_bounds = array<i64: 128, 128>}, {pipeline_mode = #tpu.pipeline_mode<synchronous>, transform_indices = @transform_13, window_bounds = array<i64: 1, 128>}, {transform_indices = @transform_14, window_bounds = array<i64: 2, 128>}]} {
    %cst = arith.constant 0.000000e+00 : f32
    %0 = vector.broadcast %cst : f32 to vector<2x8x128xf32>
    %c0 = arith.constant 0 : index
    %c0_0 = arith.constant 0 : index
    %c0_1 = arith.constant 0 : index
    %1 = vector.load %arg16[%c0, %c0_0, %c0_1] : memref<2x16x128xf32, #tpu.memory_space<vmem>>, vector<2x8x128xf32>
    tpu.vector_store %arg16[%c0, %c0_0, %c0_1], %0 {strides = array<i32>} : memref<2x16x128xf32, #tpu.memory_space<vmem>>, vector<2x8x128xf32>,
    %c0_2 = arith.constant 0 : index
    %c0_3 = arith.constant 0 : index
    %c0_4 = arith.constant 0 : index
    %2 = vector.load %arg1[%c0_2, %c0_3, %c0_4] : memref<2x8x128xf32, #tpu.memory_space<vmem>>, vector<2x8x128xf32>
    %3 = vector.shape_cast %2 : vector<2x8x128xf32> to vector<16x128xf32>
    %4 = vector.shape_cast %3 : vector<16x128xf32> to vector<2x8x128xf32>
    %c0_5 = arith.constant 0 : index
    %c8 = arith.constant 8 : index
    %c0_6 = arith.constant 0 : index
    %5 = vector.load %arg16[%c0_5, %c8, %c0_6] : memref<2x16x128xf32, #tpu.memory_space<vmem>>, vector<2x8x128xf32>
    tpu.vector_store %arg16[%c0_5, %c8, %c0_6], %4 {strides = array<i32>} : memref<2x16x128xf32, #tpu.memory_space<vmem>>, vector<2x8x128xf32>,
    %c0_7 = arith.constant 0 : index
    %c4 = arith.constant 4 : index
    %c0_8 = arith.constant 0 : index
    %6 = vector.load %arg16[%c0_7, %c4, %c0_8] : memref<2x16x128xf32, #tpu.memory_space<vmem>>, vector<2x8x128xf32>
    %7 = vector.shape_cast %6 : vector<2x8x128xf32> to vector<16x128xf32>
    %8 = arith.truncf %7 : vector<16x128xf32> to vector<16x128xbf16>
    %c0_9 = arith.constant 0 : index
    %c5 = arith.constant 5 : index
    %c0_10 = arith.constant 0 : index
    %9 = vector.load %arg16[%c0_9, %c5, %c0_10] : memref<2x16x128xf32, #tpu.memory_space<vmem>>, vector<2x8x128xf32>
    %10 = vector.shape_cast %9 : vector<2x8x128xf32> to vector<16x128xf32>
    %11 = arith.truncf %10 : vector<16x128xf32> to vector<16x128xbf16>
    %c0_11 = arith.constant 0 : index
    %c6 = arith.constant 6 : index
    %c0_12 = arith.constant 0 : index
    %12 = vector.load %arg16[%c0_11, %c6, %c0_12] : memref<2x16x128xf32, #tpu.memory_space<vmem>>, vector<2x8x128xf32>
    %13 = vector.shape_cast %12 : vector<2x8x128xf32> to vector<16x128xf32>
    %14 = arith.truncf %13 : vector<16x128xf32> to vector<16x128xbf16>
    %c0_13 = arith.constant 0 : index
    %c7 = arith.constant 7 : index
    %c0_14 = arith.constant 0 : index
    %15 = vector.load %arg16[%c0_13, %c7, %c0_14] : memref<2x16x128xf32, #tpu.memory_space<vmem>>, vector<2x8x128xf32>
    %16 = vector.shape_cast %15 : vector<2x8x128xf32> to vector<16x128xf32>
    %17 = arith.truncf %16 : vector<16x128xf32> to vector<16x128xbf16>
    %c0_15 = arith.constant 0 : index
    %c8_16 = arith.constant 8 : index
    %c0_17 = arith.constant 0 : index
    %18 = vector.load %arg16[%c0_15, %c8_16, %c0_17] : memref<2x16x128xf32, #tpu.memory_space<vmem>>, vector<2x8x128xf32>
    %19 = vector.shape_cast %18 : vector<2x8x128xf32> to vector<16x128xf32>
    %20 = arith.truncf %19 : vector<16x128xf32> to vector<16x128xbf16>
    %c0_18 = arith.constant 0 : index
    %c0_19 = arith.constant 0 : index
    %c0_20 = arith.constant 0 : index
    %21 = vector.load %arg2[%c0_18, %c0_19, %c0_20] : memref<2x512x128xbf16, #tpu.memory_space<vmem>>, vector<1x128x128xbf16>
    %22 = vector.shape_cast %21 : vector<1x128x128xbf16> to vector<128x128xbf16>
    %cst_21 = arith.constant dense<0.000000e+00> : vector<16x128xf32>
    %23 = tpu.matmul %8, %22, %cst_21 {dimension_numbers = #tpu.dot_dimension_numbers<[1], [0], [0], [1], [0, 0, 1, 1], [], []>} : vector<16x128xbf16>, vector<128x128xbf16>, vector<16x128xf32> -> vector<16x128xf32>
    %c0_22 = arith.constant 0 : index
    %c128 = arith.constant 128 : index
    %c0_23 = arith.constant 0 : index
    %24 = vector.load %arg2[%c0_22, %c128, %c0_23] : memref<2x512x128xbf16, #tpu.memory_space<vmem>>, vector<1x128x128xbf16>
    %25 = vector.shape_cast %24 : vector<1x128x128xbf16> to vector<128x128xbf16>
    %cst_24 = arith.constant dense<0.000000e+00> : vector<16x128xf32>
    %26 = tpu.matmul %11, %25, %cst_24 {dimension_numbers = #tpu.dot_dimension_numbers<[1], [0], [0], [1], [0, 0, 1, 1], [], []>} : vector<16x128xbf16>, vector<128x128xbf16>, vector<16x128xf32> -> vector<16x128xf32>
    %27 = arith.addf %23, %26 : vector<16x128xf32>
    %c0_25 = arith.constant 0 : index
    %c256 = arith.constant 256 : index
    %c0_26 = arith.constant 0 : index
    %28 = vector.load %arg2[%c0_25, %c256, %c0_26] : memref<2x512x128xbf16, #tpu.memory_space<vmem>>, vector<1x128x128xbf16>
    %29 = vector.shape_cast %28 : vector<1x128x128xbf16> to vector<128x128xbf16>
    %cst_27 = arith.constant dense<0.000000e+00> : vector<16x128xf32>
    %30 = tpu.matmul %14, %29, %cst_27 {dimension_numbers = #tpu.dot_dimension_numbers<[1], [0], [0], [1], [0, 0, 1, 1], [], []>} : vector<16x128xbf16>, vector<128x128xbf16>, vector<16x128xf32> -> vector<16x128xf32>
    %31 = arith.addf %27, %30 : vector<16x128xf32>
    %c0_28 = arith.constant 0 : index
    %c384 = arith.constant 384 : index
    %c0_29 = arith.constant 0 : index
    %32 = vector.load %arg2[%c0_28, %c384, %c0_29] : memref<2x512x128xbf16, #tpu.memory_space<vmem>>, vector<1x128x128xbf16>
    %33 = vector.shape_cast %32 : vector<1x128x128xbf16> to vector<128x128xbf16>
    %cst_30 = arith.constant dense<0.000000e+00> : vector<16x128xf32>
    %34 = tpu.matmul %17, %33, %cst_30 {dimension_numbers = #tpu.dot_dimension_numbers<[1], [0], [0], [1], [0, 0, 1, 1], [], []>} : vector<16x128xbf16>, vector<128x128xbf16>, vector<16x128xf32> -> vector<16x128xf32>
    %35 = arith.addf %31, %34 : vector<16x128xf32>
    %c0_31 = arith.constant 0 : index
    %c0_32 = arith.constant 0 : index
    %c0_33 = arith.constant 0 : index
    %36 = vector.load %arg3[%c0_31, %c0_32, %c0_33] : memref<2x128x256xbf16, #tpu.memory_space<vmem>>, vector<1x128x256xbf16>
    %37 = vector.shape_cast %36 : vector<1x128x256xbf16> to vector<128x256xbf16>
    %cst_34 = arith.constant dense<0.000000e+00> : vector<16x256xf32>
    %38 = tpu.matmul %20, %37, %cst_34 {dimension_numbers = #tpu.dot_dimension_numbers<[1], [0], [0], [1], [0, 0, 1, 1], [], []>} : vector<16x128xbf16>, vector<128x256xbf16>, vector<16x256xf32> -> vector<16x256xf32>
    %39 = vector.extract_strided_slice %38 {offsets = [0, 0], sizes = [16, 128], strides = [1, 1]} : vector<16x256xf32> to vector<16x128xf32>
    %40 = arith.addf %35, %39 : vector<16x128xf32>
    %41 = vector.extract_strided_slice %38 {offsets = [0, 128], sizes = [16, 128], strides = [1, 1]} : vector<16x256xf32> to vector<16x128xf32>
    %c0_35 = arith.constant 0 : index
    %c0_36 = arith.constant 0 : index
    %c0_37 = arith.constant 0 : index
    %42 = vector.load %arg9[%c0_35, %c0_36, %c0_37] : memref<2x1x128xf32, #tpu.memory_space<vmem>>, vector<1x1x128xf32>
    %43 = vector.shape_cast %42 : vector<1x1x128xf32> to vector<1x128xf32>
    %44 = vector.broadcast %43 : vector<1x128xf32> to vector<16x128xf32>
    %45 = arith.addf %41, %44 : vector<16x128xf32>
    %c0_38 = arith.constant 0 : index
    %c0_39 = arith.constant 0 : index
    %c0_40 = arith.constant 0 : index
    %46 = vector.load %arg4[%c0_38, %c0_39, %c0_40] : memref<2x1x128xf32, #tpu.memory_space<vmem>>, vector<1x1x128xf32>
    %47 = vector.shape_cast %46 : vector<1x1x128xf32> to vector<1x128xf32>
    %48 = vector.broadcast %47 : vector<1x128xf32> to vector<16x128xf32>
    %49 = arith.mulf %40, %48 : vector<16x128xf32>
    %c0_41 = arith.constant 0 : index
    %c0_42 = arith.constant 0 : index
    %c0_43 = arith.constant 0 : index
    %50 = vector.load %arg5[%c0_41, %c0_42, %c0_43] : memref<2x1x128xf32, #tpu.memory_space<vmem>>, vector<1x1x128xf32>
    %51 = vector.shape_cast %50 : vector<1x1x128xf32> to vector<1x128xf32>
    %52 = vector.broadcast %51 : vector<1x128xf32> to vector<16x128xf32>
    %53 = arith.addf %49, %52 : vector<16x128xf32>
    %cst_44 = arith.constant 0.000000e+00 : f32
    %54 = vector.broadcast %cst_44 : f32 to vector<16x128xf32>
    %55 = arith.maximumf %53, %54 : vector<16x128xf32>
    %56 = vector.shape_cast %55 : vector<16x128xf32> to vector<2x8x128xf32>
    %c0_45 = arith.constant 0 : index
    %c8_46 = arith.constant 8 : index
    %c0_47 = arith.constant 0 : index
    %57 = vector.load %arg16[%c0_45, %c8_46, %c0_47] : memref<2x16x128xf32, #tpu.memory_space<vmem>>, vector<2x8x128xf32>
    tpu.vector_store %arg16[%c0_45, %c8_46, %c0_47], %56 {strides = array<i32>} : memref<2x16x128xf32, #tpu.memory_space<vmem>>, vector<2x8x128xf32>,
    %c0_48 = arith.constant 0 : index
    %c4_49 = arith.constant 4 : index
    %c0_50 = arith.constant 0 : index
    %58 = vector.load %arg16[%c0_48, %c4_49, %c0_50] : memref<2x16x128xf32, #tpu.memory_space<vmem>>, vector<2x8x128xf32>
    %59 = vector.shape_cast %58 : vector<2x8x128xf32> to vector<16x128xf32>
    %60 = arith.truncf %59 : vector<16x128xf32> to vector<16x128xbf16>
    %c0_51 = arith.constant 0 : index
    %c5_52 = arith.constant 5 : index
    %c0_53 = arith.constant 0 : index
    %61 = vector.load %arg16[%c0_51, %c5_52, %c0_53] : memref<2x16x128xf32, #tpu.memory_space<vmem>>, vector<2x8x128xf32>
    %62 = vector.shape_cast %61 : vector<2x8x128xf32> to vector<16x128xf32>
    %63 = arith.truncf %62 : vector<16x128xf32> to vector<16x128xbf16>
    %c0_54 = arith.constant 0 : index
    %c6_55 = arith.constant 6 : index
    %c0_56 = arith.constant 0 : index
    %64 = vector.load %arg16[%c0_54, %c6_55, %c0_56] : memref<2x16x128xf32, #tpu.memory_space<vmem>>, vector<2x8x128xf32>
    %65 = vector.shape_cast %64 : vector<2x8x128xf32> to vector<16x128xf32>
    %66 = arith.truncf %65 : vector<16x128xf32> to vector<16x128xbf16>
    %c0_57 = arith.constant 0 : index
    %c7_58 = arith.constant 7 : index
    %c0_59 = arith.constant 0 : index
    %67 = vector.load %arg16[%c0_57, %c7_58, %c0_59] : memref<2x16x128xf32, #tpu.memory_space<vmem>>, vector<2x8x128xf32>
    %68 = vector.shape_cast %67 : vector<2x8x128xf32> to vector<16x128xf32>
    %69 = arith.truncf %68 : vector<16x128xf32> to vector<16x128xbf16>
    %c0_60 = arith.constant 0 : index
    %c8_61 = arith.constant 8 : index
    %c0_62 = arith.constant 0 : index
    %70 = vector.load %arg16[%c0_60, %c8_61, %c0_62] : memref<2x16x128xf32, #tpu.memory_space<vmem>>, vector<2x8x128xf32>
    %71 = vector.shape_cast %70 : vector<2x8x128xf32> to vector<16x128xf32>
    %72 = arith.truncf %71 : vector<16x128xf32> to vector<16x128xbf16>
    %c0_63 = arith.constant 0 : index
    %c0_64 = arith.constant 0 : index
    %c0_65 = arith.constant 0 : index
    %73 = vector.load %arg6[%c0_63, %c0_64, %c0_65] : memref<2x640x128xbf16, #tpu.memory_space<vmem>>, vector<1x128x128xbf16>
    %74 = vector.shape_cast %73 : vector<1x128x128xbf16> to vector<128x128xbf16>
    %cst_66 = arith.constant dense<0.000000e+00> : vector<16x128xf32>
    %75 = tpu.matmul %60, %74, %cst_66 {dimension_numbers = #tpu.dot_dimension_numbers<[1], [0], [0], [1], [0, 0, 1, 1], [], []>} : vector<16x128xbf16>, vector<128x128xbf16>, vector<16x128xf32> -> vector<16x128xf32>
    %c0_67 = arith.constant 0 : index
    %c128_68 = arith.constant 128 : index
    %c0_69 = arith.constant 0 : index
    %76 = vector.load %arg6[%c0_67, %c128_68, %c0_69] : memref<2x640x128xbf16, #tpu.memory_space<vmem>>, vector<1x128x128xbf16>
    %77 = vector.shape_cast %76 : vector<1x128x128xbf16> to vector<128x128xbf16>
    %cst_70 = arith.constant dense<0.000000e+00> : vector<16x128xf32>
    %78 = tpu.matmul %63, %77, %cst_70 {dimension_numbers = #tpu.dot_dimension_numbers<[1], [0], [0], [1], [0, 0, 1, 1], [], []>} : vector<16x128xbf16>, vector<128x128xbf16>, vector<16x128xf32> -> vector<16x128xf32>
    %79 = arith.addf %75, %78 : vector<16x128xf32>
    %c0_71 = arith.constant 0 : index
    %c256_72 = arith.constant 256 : index
    %c0_73 = arith.constant 0 : index
    %80 = vector.load %arg6[%c0_71, %c256_72, %c0_73] : memref<2x640x128xbf16, #tpu.memory_space<vmem>>, vector<1x128x128xbf16>
    %81 = vector.shape_cast %80 : vector<1x128x128xbf16> to vector<128x128xbf16>
    %cst_74 = arith.constant dense<0.000000e+00> : vector<16x128xf32>
    %82 = tpu.matmul %66, %81, %cst_74 {dimension_numbers = #tpu.dot_dimension_numbers<[1], [0], [0], [1], [0, 0, 1, 1], [], []>} : vector<16x128xbf16>, vector<128x128xbf16>, vector<16x128xf32> -> vector<16x128xf32>
    %83 = arith.addf %79, %82 : vector<16x128xf32>
    %c0_75 = arith.constant 0 : index
    %c384_76 = arith.constant 384 : index
    %c0_77 = arith.constant 0 : index
    %84 = vector.load %arg6[%c0_75, %c384_76, %c0_77] : memref<2x640x128xbf16, #tpu.memory_space<vmem>>, vector<1x128x128xbf16>
    %85 = vector.shape_cast %84 : vector<1x128x128xbf16> to vector<128x128xbf16>
    %cst_78 = arith.constant dense<0.000000e+00> : vector<16x128xf32>
    %86 = tpu.matmul %69, %85, %cst_78 {dimension_numbers = #tpu.dot_dimension_numbers<[1], [0], [0], [1], [0, 0, 1, 1], [], []>} : vector<16x128xbf16>, vector<128x128xbf16>, vector<16x128xf32> -> vector<16x128xf32>
    %87 = arith.addf %83, %86 : vector<16x128xf32>
    %c0_79 = arith.constant 0 : index
    %c512 = arith.constant 512 : index
    %c0_80 = arith.constant 0 : index
    %88 = vector.load %arg6[%c0_79, %c512, %c0_80] : memref<2x640x128xbf16, #tpu.memory_space<vmem>>, vector<1x128x128xbf16>
    %89 = vector.shape_cast %88 : vector<1x128x128xbf16> to vector<128x128xbf16>
    %cst_81 = arith.constant dense<0.000000e+00> : vector<16x128xf32>
    %90 = tpu.matmul %72, %89, %cst_81 {dimension_numbers = #tpu.dot_dimension_numbers<[1], [0], [0], [1], [0, 0, 1, 1], [], []>} : vector<16x128xbf16>, vector<128x128xbf16>, vector<16x128xf32> -> vector<16x128xf32>
    %91 = arith.addf %87, %90 : vector<16x128xf32>
    %c0_82 = arith.constant 0 : index
    %c0_83 = arith.constant 0 : index
    %c0_84 = arith.constant 0 : index
    %92 = vector.load %arg7[%c0_82, %c0_83, %c0_84] : memref<2x1x128xf32, #tpu.memory_space<vmem>>, vector<1x1x128xf32>
    %93 = vector.shape_cast %92 : vector<1x1x128xf32> to vector<1x128xf32>
    %94 = vector.broadcast %93 : vector<1x128xf32> to vector<16x128xf32>
    %95 = arith.mulf %91, %94 : vector<16x128xf32>
    %c0_85 = arith.constant 0 : index
    %c0_86 = arith.constant 0 : index
    %c0_87 = arith.constant 0 : index
    %96 = vector.load %arg8[%c0_85, %c0_86, %c0_87] : memref<2x1x128xf32, #tpu.memory_space<vmem>>, vector<1x1x128xf32>
    %97 = vector.shape_cast %96 : vector<1x1x128xf32> to vector<1x128xf32>
    %98 = vector.broadcast %97 : vector<1x128xf32> to vector<16x128xf32>
    %99 = arith.addf %95, %98 : vector<16x128xf32>
    %cst_88 = arith.constant 0.000000e+00 : f32
    %100 = vector.broadcast %cst_88 : f32 to vector<16x128xf32>
    %101 = arith.maximumf %99, %100 : vector<16x128xf32>
    %102 = arith.addf %101, %45 : vector<16x128xf32>
    %cst_89 = arith.constant 0.000000e+00 : f32
    %103 = vector.broadcast %cst_89 : f32 to vector<16x128xf32>
    %104 = arith.maximumf %102, %103 : vector<16x128xf32>
    %105 = vector.shape_cast %104 : vector<16x128xf32> to vector<2x8x128xf32>
    %c0_90 = arith.constant 0 : index
    %c8_91 = arith.constant 8 : index
    %c0_92 = arith.constant 0 : index
    %106 = vector.load %arg16[%c0_90, %c8_91, %c0_92] : memref<2x16x128xf32, #tpu.memory_space<vmem>>, vector<2x8x128xf32>
    tpu.vector_store %arg16[%c0_90, %c8_91, %c0_92], %105 {strides = array<i32>} : memref<2x16x128xf32, #tpu.memory_space<vmem>>, vector<2x8x128xf32>,
    %c0_93 = arith.constant 0 : index
    %c0_94 = arith.constant 0 : index
    %c0_95 = arith.constant 0 : index
    %107 = vector.load %arg16[%c0_93, %c0_94, %c0_95] : memref<2x16x128xf32, #tpu.memory_space<vmem>>, vector<2x8x128xf32>
    %108 = vector.shape_cast %107 : vector<2x8x128xf32> to vector<16x128xf32>
    %109 = arith.truncf %108 : vector<16x128xf32> to vector<16x128xbf16>
    %c0_96 = arith.constant 0 : index
    %c2 = arith.constant 2 : index
    %c0_97 = arith.constant 0 : index
    %110 = vector.load %arg16[%c0_96, %c2, %c0_97] : memref<2x16x128xf32, #tpu.memory_space<vmem>>, vector<2x8x128xf32>
    %111 = vector.shape_cast %110 : vector<2x8x128xf32> to vector<16x128xf32>
    %112 = arith.truncf %111 : vector<16x128xf32> to vector<16x128xbf16>
    %c0_98 = arith.constant 0 : index
    %c4_99 = arith.constant 4 : index
    %c0_100 = arith.constant 0 : index
    %113 = vector.load %arg16[%c0_98, %c4_99, %c0_100] : memref<2x16x128xf32, #tpu.memory_space<vmem>>, vector<2x8x128xf32>
    %114 = vector.shape_cast %113 : vector<2x8x128xf32> to vector<16x128xf32>
    %115 = arith.truncf %114 : vector<16x128xf32> to vector<16x128xbf16>
    %c0_101 = arith.constant 0 : index
    %c6_102 = arith.constant 6 : index
    %c0_103 = arith.constant 0 : index
    %116 = vector.load %arg16[%c0_101, %c6_102, %c0_103] : memref<2x16x128xf32, #tpu.memory_space<vmem>>, vector<2x8x128xf32>
    %117 = vector.shape_cast %116 : vector<2x8x128xf32> to vector<16x128xf32>
    %118 = arith.truncf %117 : vector<16x128xf32> to vector<16x128xbf16>
    %c0_104 = arith.constant 0 : index
    %c8_105 = arith.constant 8 : index
    %c0_106 = arith.constant 0 : index
    %119 = vector.load %arg16[%c0_104, %c8_105, %c0_106] : memref<2x16x128xf32, #tpu.memory_space<vmem>>, vector<2x8x128xf32>
    %120 = vector.shape_cast %119 : vector<2x8x128xf32> to vector<16x128xf32>
    %121 = arith.truncf %120 : vector<16x128xf32> to vector<16x128xbf16>
    %c1 = arith.constant 1 : index
    %c0_107 = arith.constant 0 : index
    %c0_108 = arith.constant 0 : index
    %122 = vector.load %arg2[%c1, %c0_107, %c0_108] : memref<2x512x128xbf16, #tpu.memory_space<vmem>>, vector<1x128x128xbf16>
    %123 = vector.shape_cast %122 : vector<1x128x128xbf16> to vector<128x128xbf16>
    %cst_109 = arith.constant dense<0.000000e+00> : vector<16x128xf32>
    %124 = tpu.matmul %109, %123, %cst_109 {dimension_numbers = #tpu.dot_dimension_numbers<[1], [0], [0], [1], [0, 0, 1, 1], [], []>} : vector<16x128xbf16>, vector<128x128xbf16>, vector<16x128xf32> -> vector<16x128xf32>
    %c1_110 = arith.constant 1 : index
    %c128_111 = arith.constant 128 : index
    %c0_112 = arith.constant 0 : index
    %125 = vector.load %arg2[%c1_110, %c128_111, %c0_112] : memref<2x512x128xbf16, #tpu.memory_space<vmem>>, vector<1x128x128xbf16>
    %126 = vector.shape_cast %125 : vector<1x128x128xbf16> to vector<128x128xbf16>
    %cst_113 = arith.constant dense<0.000000e+00> : vector<16x128xf32>
    %127 = tpu.matmul %112, %126, %cst_113 {dimension_numbers = #tpu.dot_dimension_numbers<[1], [0], [0], [1], [0, 0, 1, 1], [], []>} : vector<16x128xbf16>, vector<128x128xbf16>, vector<16x128xf32> -> vector<16x128xf32>
    %128 = arith.addf %124, %127 : vector<16x128xf32>
    %c1_114 = arith.constant 1 : index
    %c256_115 = arith.constant 256 : index
    %c0_116 = arith.constant 0 : index
    %129 = vector.load %arg2[%c1_114, %c256_115, %c0_116] : memref<2x512x128xbf16, #tpu.memory_space<vmem>>, vector<1x128x128xbf16>
    %130 = vector.shape_cast %129 : vector<1x128x128xbf16> to vector<128x128xbf16>
    %cst_117 = arith.constant dense<0.000000e+00> : vector<16x128xf32>
    %131 = tpu.matmul %115, %130, %cst_117 {dimension_numbers = #tpu.dot_dimension_numbers<[1], [0], [0], [1], [0, 0, 1, 1], [], []>} : vector<16x128xbf16>, vector<128x128xbf16>, vector<16x128xf32> -> vector<16x128xf32>
    %132 = arith.addf %128, %131 : vector<16x128xf32>
    %c1_118 = arith.constant 1 : index
    %c384_119 = arith.constant 384 : index
    %c0_120 = arith.constant 0 : index
    %133 = vector.load %arg2[%c1_118, %c384_119, %c0_120] : memref<2x512x128xbf16, #tpu.memory_space<vmem>>, vector<1x128x128xbf16>
    %134 = vector.shape_cast %133 : vector<1x128x128xbf16> to vector<128x128xbf16>
    %cst_121 = arith.constant dense<0.000000e+00> : vector<16x128xf32>
    %135 = tpu.matmul %118, %134, %cst_121 {dimension_numbers = #tpu.dot_dimension_numbers<[1], [0], [0], [1], [0, 0, 1, 1], [], []>} : vector<16x128xbf16>, vector<128x128xbf16>, vector<16x128xf32> -> vector<16x128xf32>
    %136 = arith.addf %132, %135 : vector<16x128xf32>
    %c1_122 = arith.constant 1 : index
    %c0_123 = arith.constant 0 : index
    %c0_124 = arith.constant 0 : index
    %137 = vector.load %arg3[%c1_122, %c0_123, %c0_124] : memref<2x128x256xbf16, #tpu.memory_space<vmem>>, vector<1x128x256xbf16>
    %138 = vector.shape_cast %137 : vector<1x128x256xbf16> to vector<128x256xbf16>
    %cst_125 = arith.constant dense<0.000000e+00> : vector<16x256xf32>
    %139 = tpu.matmul %121, %138, %cst_125 {dimension_numbers = #tpu.dot_dimension_numbers<[1], [0], [0], [1], [0, 0, 1, 1], [], []>} : vector<16x128xbf16>, vector<128x256xbf16>, vector<16x256xf32> -> vector<16x256xf32>
    %140 = vector.extract_strided_slice %139 {offsets = [0, 0], sizes = [16, 128], strides = [1, 1]} : vector<16x256xf32> to vector<16x128xf32>
    %141 = arith.addf %136, %140 : vector<16x128xf32>
    %142 = vector.extract_strided_slice %139 {offsets = [0, 128], sizes = [16, 128], strides = [1, 1]} : vector<16x256xf32> to vector<16x128xf32>
    %c1_126 = arith.constant 1 : index
    %c0_127 = arith.constant 0 : index
    %c0_128 = arith.constant 0 : index
    %143 = vector.load %arg9[%c1_126, %c0_127, %c0_128] : memref<2x1x128xf32, #tpu.memory_space<vmem>>, vector<1x1x128xf32>
    %144 = vector.shape_cast %143 : vector<1x1x128xf32> to vector<1x128xf32>
    %145 = vector.broadcast %144 : vector<1x128xf32> to vector<16x128xf32>
    %146 = arith.addf %142, %145 : vector<16x128xf32>
    %c1_129 = arith.constant 1 : index
    %c0_130 = arith.constant 0 : index
    %c0_131 = arith.constant 0 : index
    %147 = vector.load %arg4[%c1_129, %c0_130, %c0_131] : memref<2x1x128xf32, #tpu.memory_space<vmem>>, vector<1x1x128xf32>
    %148 = vector.shape_cast %147 : vector<1x1x128xf32> to vector<1x128xf32>
    %149 = vector.broadcast %148 : vector<1x128xf32> to vector<16x128xf32>
    %150 = arith.mulf %141, %149 : vector<16x128xf32>
    %c1_132 = arith.constant 1 : index
    %c0_133 = arith.constant 0 : index
    %c0_134 = arith.constant 0 : index
    %151 = vector.load %arg5[%c1_132, %c0_133, %c0_134] : memref<2x1x128xf32, #tpu.memory_space<vmem>>, vector<1x1x128xf32>
    %152 = vector.shape_cast %151 : vector<1x1x128xf32> to vector<1x128xf32>
    %153 = vector.broadcast %152 : vector<1x128xf32> to vector<16x128xf32>
    %154 = arith.addf %150, %153 : vector<16x128xf32>
    %cst_135 = arith.constant 0.000000e+00 : f32
    %155 = vector.broadcast %cst_135 : f32 to vector<16x128xf32>
    %156 = arith.maximumf %154, %155 : vector<16x128xf32>
    %157 = vector.shape_cast %156 : vector<16x128xf32> to vector<2x8x128xf32>
    %c0_136 = arith.constant 0 : index
    %c8_137 = arith.constant 8 : index
    %c0_138 = arith.constant 0 : index
    %158 = vector.load %arg16[%c0_136, %c8_137, %c0_138] : memref<2x16x128xf32, #tpu.memory_space<vmem>>, vector<2x8x128xf32>
    tpu.vector_store %arg16[%c0_136, %c8_137, %c0_138], %157 {strides = array<i32>} : memref<2x16x128xf32, #tpu.memory_space<vmem>>, vector<2x8x128xf32>,
    %c0_139 = arith.constant 0 : index
    %c0_140 = arith.constant 0 : index
    %c0_141 = arith.constant 0 : index
    %159 = vector.load %arg16[%c0_139, %c0_140, %c0_141] : memref<2x16x128xf32, #tpu.memory_space<vmem>>, vector<2x8x128xf32>
    %160 = vector.shape_cast %159 : vector<2x8x128xf32> to vector<16x128xf32>
    %161 = arith.truncf %160 : vector<16x128xf32> to vector<16x128xbf16>
    %c0_142 = arith.constant 0 : index
    %c2_143 = arith.constant 2 : index
    %c0_144 = arith.constant 0 : index
    %162 = vector.load %arg16[%c0_142, %c2_143, %c0_144] : memref<2x16x128xf32, #tpu.memory_space<vmem>>, vector<2x8x128xf32>
    %163 = vector.shape_cast %162 : vector<2x8x128xf32> to vector<16x128xf32>
    %164 = arith.truncf %163 : vector<16x128xf32> to vector<16x128xbf16>
    %c0_145 = arith.constant 0 : index
    %c4_146 = arith.constant 4 : index
    %c0_147 = arith.constant 0 : index
    %165 = vector.load %arg16[%c0_145, %c4_146, %c0_147] : memref<2x16x128xf32, #tpu.memory_space<vmem>>, vector<2x8x128xf32>
    %166 = vector.shape_cast %165 : vector<2x8x128xf32> to vector<16x128xf32>
    %167 = arith.truncf %166 : vector<16x128xf32> to vector<16x128xbf16>
    %c0_148 = arith.constant 0 : index
    %c6_149 = arith.constant 6 : index
    %c0_150 = arith.constant 0 : index
    %168 = vector.load %arg16[%c0_148, %c6_149, %c0_150] : memref<2x16x128xf32, #tpu.memory_space<vmem>>, vector<2x8x128xf32>
    %169 = vector.shape_cast %168 : vector<2x8x128xf32> to vector<16x128xf32>
    %170 = arith.truncf %169 : vector<16x128xf32> to vector<16x128xbf16>
    %c0_151 = arith.constant 0 : index
    %c8_152 = arith.constant 8 : index
    %c0_153 = arith.constant 0 : index
    %171 = vector.load %arg16[%c0_151, %c8_152, %c0_153] : memref<2x16x128xf32, #tpu.memory_space<vmem>>, vector<2x8x128xf32>
    %172 = vector.shape_cast %171 : vector<2x8x128xf32> to vector<16x128xf32>
    %173 = arith.truncf %172 : vector<16x128xf32> to vector<16x128xbf16>
    %c1_154 = arith.constant 1 : index
    %c0_155 = arith.constant 0 : index
    %c0_156 = arith.constant 0 : index
    %174 = vector.load %arg6[%c1_154, %c0_155, %c0_156] : memref<2x640x128xbf16, #tpu.memory_space<vmem>>, vector<1x128x128xbf16>
    %175 = vector.shape_cast %174 : vector<1x128x128xbf16> to vector<128x128xbf16>
    %cst_157 = arith.constant dense<0.000000e+00> : vector<16x128xf32>
    %176 = tpu.matmul %161, %175, %cst_157 {dimension_numbers = #tpu.dot_dimension_numbers<[1], [0], [0], [1], [0, 0, 1, 1], [], []>} : vector<16x128xbf16>, vector<128x128xbf16>, vector<16x128xf32> -> vector<16x128xf32>
    %c1_158 = arith.constant 1 : index
    %c128_159 = arith.constant 128 : index
    %c0_160 = arith.constant 0 : index
    %177 = vector.load %arg6[%c1_158, %c128_159, %c0_160] : memref<2x640x128xbf16, #tpu.memory_space<vmem>>, vector<1x128x128xbf16>
    %178 = vector.shape_cast %177 : vector<1x128x128xbf16> to vector<128x128xbf16>
    %cst_161 = arith.constant dense<0.000000e+00> : vector<16x128xf32>
    %179 = tpu.matmul %164, %178, %cst_161 {dimension_numbers = #tpu.dot_dimension_numbers<[1], [0], [0], [1], [0, 0, 1, 1], [], []>} : vector<16x128xbf16>, vector<128x128xbf16>, vector<16x128xf32> -> vector<16x128xf32>
    %180 = arith.addf %176, %179 : vector<16x128xf32>
    %c1_162 = arith.constant 1 : index
    %c256_163 = arith.constant 256 : index
    %c0_164 = arith.constant 0 : index
    %181 = vector.load %arg6[%c1_162, %c256_163, %c0_164] : memref<2x640x128xbf16, #tpu.memory_space<vmem>>, vector<1x128x128xbf16>
    %182 = vector.shape_cast %181 : vector<1x128x128xbf16> to vector<128x128xbf16>
    %cst_165 = arith.constant dense<0.000000e+00> : vector<16x128xf32>
    %183 = tpu.matmul %167, %182, %cst_165 {dimension_numbers = #tpu.dot_dimension_numbers<[1], [0], [0], [1], [0, 0, 1, 1], [], []>} : vector<16x128xbf16>, vector<128x128xbf16>, vector<16x128xf32> -> vector<16x128xf32>
    %184 = arith.addf %180, %183 : vector<16x128xf32>
    %c1_166 = arith.constant 1 : index
    %c384_167 = arith.constant 384 : index
    %c0_168 = arith.constant 0 : index
    %185 = vector.load %arg6[%c1_166, %c384_167, %c0_168] : memref<2x640x128xbf16, #tpu.memory_space<vmem>>, vector<1x128x128xbf16>
    %186 = vector.shape_cast %185 : vector<1x128x128xbf16> to vector<128x128xbf16>
    %cst_169 = arith.constant dense<0.000000e+00> : vector<16x128xf32>
    %187 = tpu.matmul %170, %186, %cst_169 {dimension_numbers = #tpu.dot_dimension_numbers<[1], [0], [0], [1], [0, 0, 1, 1], [], []>} : vector<16x128xbf16>, vector<128x128xbf16>, vector<16x128xf32> -> vector<16x128xf32>
    %188 = arith.addf %184, %187 : vector<16x128xf32>
    %c1_170 = arith.constant 1 : index
    %c512_171 = arith.constant 512 : index
    %c0_172 = arith.constant 0 : index
    %189 = vector.load %arg6[%c1_170, %c512_171, %c0_172] : memref<2x640x128xbf16, #tpu.memory_space<vmem>>, vector<1x128x128xbf16>
    %190 = vector.shape_cast %189 : vector<1x128x128xbf16> to vector<128x128xbf16>
    %cst_173 = arith.constant dense<0.000000e+00> : vector<16x128xf32>
    %191 = tpu.matmul %173, %190, %cst_173 {dimension_numbers = #tpu.dot_dimension_numbers<[1], [0], [0], [1], [0, 0, 1, 1], [], []>} : vector<16x128xbf16>, vector<128x128xbf16>, vector<16x128xf32> -> vector<16x128xf32>
    %192 = arith.addf %188, %191 : vector<16x128xf32>
    %c1_174 = arith.constant 1 : index
    %c0_175 = arith.constant 0 : index
    %c0_176 = arith.constant 0 : index
    %193 = vector.load %arg7[%c1_174, %c0_175, %c0_176] : memref<2x1x128xf32, #tpu.memory_space<vmem>>, vector<1x1x128xf32>
    %194 = vector.shape_cast %193 : vector<1x1x128xf32> to vector<1x128xf32>
    %195 = vector.broadcast %194 : vector<1x128xf32> to vector<16x128xf32>
    %196 = arith.mulf %192, %195 : vector<16x128xf32>
    %c1_177 = arith.constant 1 : index
    %c0_178 = arith.constant 0 : index
    %c0_179 = arith.constant 0 : index
    %197 = vector.load %arg8[%c1_177, %c0_178, %c0_179] : memref<2x1x128xf32, #tpu.memory_space<vmem>>, vector<1x1x128xf32>
    %198 = vector.shape_cast %197 : vector<1x1x128xf32> to vector<1x128xf32>
    %199 = vector.broadcast %198 : vector<1x128xf32> to vector<16x128xf32>
    %200 = arith.addf %196, %199 : vector<16x128xf32>
    %cst_180 = arith.constant 0.000000e+00 : f32
    %201 = vector.broadcast %cst_180 : f32 to vector<16x128xf32>
    %202 = arith.maximumf %200, %201 : vector<16x128xf32>
    %203 = arith.addf %202, %146 : vector<16x128xf32>
    %cst_181 = arith.constant 0.000000e+00 : f32
    %204 = vector.broadcast %cst_181 : f32 to vector<16x128xf32>
    %205 = arith.maximumf %203, %204 : vector<16x128xf32>
    %206 = arith.truncf %205 : vector<16x128xf32> to vector<16x128xbf16>
    %c0_182 = arith.constant 0 : index
    %c0_183 = arith.constant 0 : index
    %207 = vector.load %arg10[%c0_182, %c0_183] : memref<128x128xbf16, #tpu.memory_space<vmem>>, vector<128x128xbf16>
    %cst_184 = arith.constant dense<0.000000e+00> : vector<16x128xf32>
    %208 = tpu.matmul %206, %207, %cst_184 {dimension_numbers = #tpu.dot_dimension_numbers<[1], [0], [0], [1], [0, 0, 1, 1], [], []>} : vector<16x128xbf16>, vector<128x128xbf16>, vector<16x128xf32> -> vector<16x128xf32>
    %c0_185 = arith.constant 0 : index
    %c0_186 = arith.constant 0 : index
    %209 = vector.load %arg11[%c0_185, %c0_186] : memref<1x128xf32, #tpu.memory_space<vmem>>, vector<1x128xf32>
    %210 = vector.broadcast %209 : vector<1x128xf32> to vector<16x128xf32>
    %211 = arith.addf %208, %210 : vector<16x128xf32>
    %212 = math.tanh %211 : vector<16x128xf32>
    %213 = vector.shape_cast %212 : vector<16x128xf32> to vector<2x8x128xf32>
    %c0_187 = arith.constant 0 : index
    %c0_188 = arith.constant 0 : index
    %214 = vector.load %arg12[%c0_187, %c0_188] : memref<1x128xf32, #tpu.memory_space<vmem>>, vector<1x128xf32>
    %215 = vector.shape_cast %214 : vector<1x128xf32> to vector<1x1x128xf32>
    %216 = vector.broadcast %215 : vector<1x1x128xf32> to vector<2x8x128xf32>
    %217 = arith.mulf %213, %216 : vector<2x8x128xf32>
    %cst_189 = arith.constant dense<0.000000e+00> : vector<2x8xf32>
    %218 = vector.multi_reduction <add>, %217, %cst_189 [2] : vector<2x8x128xf32> to vector<2x8xf32>
    %219 = vector.shape_cast %218 : vector<2x8xf32> to vector<2x8x1xf32>
    %cst_190 = arith.constant dense<0xFF800000> : vector<2x1xf32>
    %220 = vector.multi_reduction <maximumf>, %219, %cst_190 [1] : vector<2x8x1xf32> to vector<2x1xf32>
    %221 = vector.shape_cast %220 : vector<2x1xf32> to vector<2x1x1xf32>
    %222 = vector.broadcast %221 : vector<2x1x1xf32> to vector<2x8x1xf32>
    %223 = arith.subf %219, %222 : vector<2x8x1xf32>
    %224 = math.exp %223 : vector<2x8x1xf32>
    %cst_191 = arith.constant dense<0.000000e+00> : vector<2x1xf32>
    %225 = vector.multi_reduction <add>, %224, %cst_191 [1] : vector<2x8x1xf32> to vector<2x1xf32>
    %226 = vector.shape_cast %225 : vector<2x1xf32> to vector<2x1x1xf32>
    %227 = vector.broadcast %226 : vector<2x1x1xf32> to vector<2x8x1xf32>
    %228 = arith.divf %224, %227 : vector<2x8x1xf32>
    %229 = vector.shape_cast %205 : vector<16x128xf32> to vector<2x8x128xf32>
    %230 = vector.broadcast %228 : vector<2x8x1xf32> to vector<2x8x128xf32>
    %231 = arith.mulf %229, %230 : vector<2x8x128xf32>
    %cst_192 = arith.constant dense<0.000000e+00> : vector<2x128xf32>
    %232 = vector.multi_reduction <add>, %231, %cst_192 [1] : vector<2x8x128xf32> to vector<2x128xf32>
    %233 = arith.truncf %232 : vector<2x128xf32> to vector<2x128xbf16>
    %c0_193 = arith.constant 0 : index
    %c0_194 = arith.constant 0 : index
    %234 = vector.load %arg13[%c0_193, %c0_194] : memref<128x128xbf16, #tpu.memory_space<vmem>>, vector<128x128xbf16>
    %cst_195 = arith.constant dense<0.000000e+00> : vector<2x128xf32>
    %235 = tpu.matmul %233, %234, %cst_195 {dimension_numbers = #tpu.dot_dimension_numbers<[1], [0], [0], [1], [0, 0, 1, 1], [], []>} : vector<2x128xbf16>, vector<128x128xbf16>, vector<2x128xf32> -> vector<2x128xf32>
    %c0_196 = arith.constant 0 : index
    %c0_197 = arith.constant 0 : index
    %236 = vector.load %arg14[%c0_196, %c0_197] : memref<1x128xf32, #tpu.memory_space<vmem>>, vector<1x128xf32>
    %237 = vector.broadcast %236 : vector<1x128xf32> to vector<2x128xf32>
    %238 = arith.addf %235, %237 : vector<2x128xf32>
    %c0_198 = arith.constant 0 : index
    %c0_199 = arith.constant 0 : index
    %239 = vector.load %arg15[%c0_198, %c0_199] : memref<2x128xf32, #tpu.memory_space<vmem>>, vector<2x128xf32>
    tpu.vector_store %arg15[%c0_198, %c0_199], %238 {strides = array<i32>} : memref<2x128xf32, #tpu.memory_space<vmem>>, vector<2x128xf32>,
    return
  }
  func.func @transform_0(%arg0: i32) -> (i32, i32, i32) {
    %c0_i32 = arith.constant 0 : i32
    %c0_i32_0 = arith.constant 0 : i32
    %c0_i32_1 = arith.constant 0 : i32
    return %arg0, %c0_i32, %c0_i32_0 : i32, i32, i32
  }
  func.func @transform_1(%arg0: i32) -> (i32, i32, i32) {
    %c0_i32 = arith.constant 0 : i32
    %c0_i32_0 = arith.constant 0 : i32
    %c0_i32_1 = arith.constant 0 : i32
    %c0_i32_2 = arith.constant 0 : i32
    return %c0_i32, %c0_i32_0, %c0_i32_1 : i32, i32, i32
  }
  func.func @transform_2(%arg0: i32) -> (i32, i32, i32) {
    %c0_i32 = arith.constant 0 : i32
    %c0_i32_0 = arith.constant 0 : i32
    %c0_i32_1 = arith.constant 0 : i32
    %c0_i32_2 = arith.constant 0 : i32
    return %c0_i32, %c0_i32_0, %c0_i32_1 : i32, i32, i32
  }
  func.func @transform_3(%arg0: i32) -> (i32, i32, i32) {
    %c0_i32 = arith.constant 0 : i32
    %c0_i32_0 = arith.constant 0 : i32
    %c0_i32_1 = arith.constant 0 : i32
    %c0_i32_2 = arith.constant 0 : i32
    return %c0_i32, %c0_i32_0, %c0_i32_1 : i32, i32, i32
  }
  func.func @transform_4(%arg0: i32) -> (i32, i32, i32) {
    %c0_i32 = arith.constant 0 : i32
    %c0_i32_0 = arith.constant 0 : i32
    %c0_i32_1 = arith.constant 0 : i32
    %c0_i32_2 = arith.constant 0 : i32
    return %c0_i32, %c0_i32_0, %c0_i32_1 : i32, i32, i32
  }
  func.func @transform_5(%arg0: i32) -> (i32, i32, i32) {
    %c0_i32 = arith.constant 0 : i32
    %c0_i32_0 = arith.constant 0 : i32
    %c0_i32_1 = arith.constant 0 : i32
    %c0_i32_2 = arith.constant 0 : i32
    return %c0_i32, %c0_i32_0, %c0_i32_1 : i32, i32, i32
  }
  func.func @transform_6(%arg0: i32) -> (i32, i32, i32) {
    %c0_i32 = arith.constant 0 : i32
    %c0_i32_0 = arith.constant 0 : i32
    %c0_i32_1 = arith.constant 0 : i32
    %c0_i32_2 = arith.constant 0 : i32
    return %c0_i32, %c0_i32_0, %c0_i32_1 : i32, i32, i32
  }
  func.func @transform_7(%arg0: i32) -> (i32, i32, i32) {
    %c0_i32 = arith.constant 0 : i32
    %c0_i32_0 = arith.constant 0 : i32
    %c0_i32_1 = arith.constant 0 : i32
    %c0_i32_2 = arith.constant 0 : i32
    return %c0_i32, %c0_i32_0, %c0_i32_1 : i32, i32, i32
  }
  func.func @transform_8(%arg0: i32) -> (i32, i32, i32) {
    %c0_i32 = arith.constant 0 : i32
    %c0_i32_0 = arith.constant 0 : i32
    %c0_i32_1 = arith.constant 0 : i32
    %c0_i32_2 = arith.constant 0 : i32
    return %c0_i32, %c0_i32_0, %c0_i32_1 : i32, i32, i32
  }
  func.func @transform_9(%arg0: i32) -> (i32, i32) {
    %c0_i32 = arith.constant 0 : i32
    %c0_i32_0 = arith.constant 0 : i32
    %c0_i32_1 = arith.constant 0 : i32
    return %c0_i32, %c0_i32_0 : i32, i32
  }
  func.func @transform_10(%arg0: i32) -> (i32, i32) {
    %c0_i32 = arith.constant 0 : i32
    %c0_i32_0 = arith.constant 0 : i32
    %c0_i32_1 = arith.constant 0 : i32
    return %c0_i32, %c0_i32_0 : i32, i32
  }
  func.func @transform_11(%arg0: i32) -> (i32, i32) {
    %c0_i32 = arith.constant 0 : i32
    %c0_i32_0 = arith.constant 0 : i32
    %c0_i32_1 = arith.constant 0 : i32
    return %c0_i32, %c0_i32_0 : i32, i32
  }
  func.func @transform_12(%arg0: i32) -> (i32, i32) {
    %c0_i32 = arith.constant 0 : i32
    %c0_i32_0 = arith.constant 0 : i32
    %c0_i32_1 = arith.constant 0 : i32
    return %c0_i32, %c0_i32_0 : i32, i32
  }
  func.func @transform_13(%arg0: i32) -> (i32, i32) {
    %c0_i32 = arith.constant 0 : i32
    %c0_i32_0 = arith.constant 0 : i32
    %c0_i32_1 = arith.constant 0 : i32
    return %c0_i32, %c0_i32_0 : i32, i32
  }
  func.func @transform_14(%arg0: i32) -> (i32, i32) {
    %c0_i32 = arith.constant 0 : i32
    %c0_i32_0 = arith.constant 0 : i32
    return %arg0, %c0_i32 : i32, i32
  }
}

</mosaic_0001>

<bundles_post_ra>
// kernel: tpu_custom_call.1
= control target key start
LH: loop header
LB: loop body
LE: loop exit
PB: predicated region body
PF: predicated region fallthrough
CT: control target
= control target key end

     0   :  { %19 = vsyncpa [#allocation4], 0  ;;  %s4552_s0 = inlined_call_operand.hbm [shape: f32[2,8,128], index: 0, kind: input, shape index: {}]   ;;  %s4553_s1 = inlined_call_operand.hbm [shape: bf16[2,512,128], index: 1, kind: input, shape index: {}]   ;;  %s4554_s2 = inlined_call_operand.hbm [shape: bf16[2,128,256], index: 2, kind: input, shape index: {}]   ;;  %s4555_s3 = inlined_call_operand.vmem [shape: f32[2,1,128], index: 3, kind: input, shape index: {}]   ;;  %s4556_s4 = inlined_call_operand.vmem [shape: f32[2,1,128], index: 4, kind: input, shape index: {}]   ;;  %s4557_s5 = inlined_call_operand.hbm [shape: bf16[2,640,128], index: 5, kind: input, shape index: {}]   ;;  %s4558_s6 = inlined_call_operand.vmem [shape: f32[2,1,128], index: 6, kind: input, shape index: {}]   ;;  %s4559_s7 = inlined_call_operand.vmem [shape: f32[2,1,128], index: 7, kind: input, shape index: {}]   ;;  %s4560_s8 = inlined_call_operand.vmem [shape: f32[2,1,128], index: 8, kind: input, shape index: {}]   ;;  %s4561_s9 = inlined_call_operand.hbm [shape: bf16[128,128], index: 9, kind: input, shape index: {}]   ;;  %s4562_s10 = inlined_call_operand.vmem [shape: f32[1,128], index: 10, kind: input, shape index: {}]   ;;  %s4563_s11 = inlined_call_operand.vmem [shape: f32[1,128], index: 11, kind: input, shape index: {}]   ;;  %s4564_s12 = inlined_call_operand.hbm [shape: bf16[128,128], index: 12, kind: input, shape index: {}]   ;;  %s4565_s13 = inlined_call_operand.vmem [shape: f32[1,128], index: 13, kind: input, shape index: {}]   ;;  %s4566_s14 = inlined_call_operand.hbm [shape: f32[2,128], index: 14, kind: output, shape index: {}]  }
   0x1   :  { %20 = vsyncpa [#allocation7], 0 }
   0x2   :  { %21 = vsyncpa [#allocation10], 0 }
   0x3   :  { %22 = vsyncpa [#allocation13], 0 }
   0x4   :  { %23 = vsyncpa [#allocation5], 0  ;;  %s4071_s29 = smov [#allocation6]   ;;  %s3907_s17 = scalar_lea.hbm %s4553_s1, 8192 }
   0x5   :  { %s41_s30 = sshll.u32 %s4071_s29, 4  ;;  %p3908_p0 = scmp.ne.s32.totalorder %s4553_s1, %s3907_s17  ;;  %s42_s30 = int_to_ptr.vmem [resolvable:$true] %s41_s30 }
   0x6   :  { %p3911_p1 = scmp.lt.u32.totalorder %s3907_s17, %s4553_s1 }
   0x8   :  { %p3913_p2 = pnand %p3911_p1, %p3908_p0 }
   0xa   :  { %3916 = shalt.err (!%p3913_p2)
}
   0xb   :  { %s3917_s22 = scalar_lea.vmem %s42_s30, 8192  ;;  %p3922_p4 = scmp.lt.s32.totalorder %s42_s30, %s42_s30 }
   0xc   :  { %p3918_p3 = scmp.ne.s32.totalorder %s42_s30, %s3917_s22  ;;  %p3923_p5 = scmp.lt.s32.totalorder %s3917_s22, %s3917_s22 }
   0xe   :  { %p3924_p6 = por %p3923_p5, %p3922_p4 }
  0x10   :  { %p3925_p7 = pnand %p3924_p6, %p3918_p3 }
  0x12   :  { %3928 = shalt.err (!%p3925_p7)
}
  0x13   :  { %s4072_s23 = smov 64   ;;  %s4073_s24 = smov 4  }
  0x14   :  { %47 = dma.hbm_to_vmem [thread:$0]  %s4553_s1, 8192, %s42_s30, [#allocation7], %s4072_s23, %s4072_s23, %s4073_s24  }
  0x15   :  { %s4074_s27 = smov [#allocation9]   ;;  %s4075_s29 = smov [#allocation3]  }
  0x16   :  { %s69_s28 = sshll.u32 %s4074_s27, 4  ;;  %s29_s15 = sshll.u32 %s4075_s29, 4  ;;  %s70_s28 = int_to_ptr.vmem [resolvable:$true] %s69_s28  ;;  %s30_s15 = int_to_ptr.vmem [resolvable:$true] %s29_s15 }
  0x17   :  { %s3929_s18 = scalar_lea.hbm %s4557_s5, 10240 }
  0x18   :  { %p3930_p8 = scmp.ne.s32.totalorder %s4557_s5, %s3929_s18  ;;  %p3933_p9 = scmp.lt.u32.totalorder %s3929_s18, %s4557_s5 }
  0x1a   :  { %p3935_p10 = pnand %p3933_p9, %p3930_p8 }
  0x1c   :  { %3938 = shalt.err (!%p3935_p10)
}
  0x1d   :  { %s3939_s1 = scalar_lea.vmem %s70_s28, 10240  ;;  %p3944_p12 = scmp.lt.s32.totalorder %s70_s28, %s70_s28 }
  0x1e   :  { %p3940_p11 = scmp.ne.s32.totalorder %s70_s28, %s3939_s1  ;;  %p3945_p13 = scmp.lt.s32.totalorder %s3939_s1, %s3939_s1 }
  0x20   :  { %p3946_p0 = por %p3945_p13, %p3944_p12 }
  0x22   :  { %p3947_p1 = pnand %p3946_p0, %p3940_p11 }
  0x24   :  { %3950 = shalt.err (!%p3947_p1)
}
  0x25   :  { %75 = dma.hbm_to_vmem [thread:$0]  %s4557_s5, 10240, %s70_s28, [#allocation10], %s4072_s23, %s4072_s23, %s4073_s24  }
  0x26   :  { %s3951_s29 = scalar_lea.hbm %s4552_s0, 256 }
  0x27   :  { %p3952_p2 = scmp.ne.s32.totalorder %s4552_s0, %s3951_s29  ;;  %p3955_p3 = scmp.lt.u32.totalorder %s3951_s29, %s4552_s0 }
  0x29   :  { %p3957_p4 = pnand %p3955_p3, %p3952_p2 }
  0x2b   :  { %3960 = shalt.err (!%p3957_p4)
}
  0x2c   :  { %s3961_s20 = scalar_lea.vmem %s30_s15, 256  ;;  %p3966_p6 = scmp.lt.s32.totalorder %s30_s15, %s30_s15 }
  0x2d   :  { %p3962_p5 = scmp.ne.s32.totalorder %s30_s15, %s3961_s20  ;;  %p3967_p7 = scmp.lt.s32.totalorder %s3961_s20, %s3961_s20 }
  0x2f   :  { %p3968_p8 = por %p3967_p7, %p3966_p6 }
  0x31   :  { %p3969_p9 = pnand %p3968_p8, %p3962_p5 }
  0x33   :  { %3972 = shalt.err (!%p3969_p9)
}
  0x34   :  { %s4076_s5 = smov 128   ;;  %s4077_s28 = smov 8  }
  0x35   :  { %35 = dma.hbm_to_vmem [thread:$0]  %s4552_s0, 256, %s30_s15, [#allocation4], %s4076_s5, %s4076_s5, %s4077_s28  }
  0x36   :  { %s4078_s1 = smov [#allocation8]   ;;  %s4079_s25 = smov [#allocation11]  }
  0x37   :  { %s53_s30 = sshll.u32 %s4078_s1, 4  ;;  %s87_s26 = sshll.u32 %s4079_s25, 4  ;;  %s54_s30 = int_to_ptr.vmem [resolvable:$true] %s53_s30  ;;  %s88_s26 = int_to_ptr.vmem [resolvable:$true] %s87_s26 }
  0x38   :  { %s3973_s16 = scalar_lea.hbm %s4554_s2, 4096 }
  0x39   :  { %p3974_p10 = scmp.ne.s32.totalorder %s4554_s2, %s3973_s16  ;;  %p3977_p11 = scmp.lt.u32.totalorder %s3973_s16, %s4554_s2 }
  0x3b   :  { %p3979_p12 = pnand %p3977_p11, %p3974_p10 }
  0x3d   :  { %3982 = shalt.err (!%p3979_p12)
}
  0x3e   :  { %s3983_s0 = scalar_lea.vmem %s54_s30, 4096  ;;  %p3988_p0 = scmp.lt.s32.totalorder %s54_s30, %s54_s30 }
  0x3f   :  { %p3984_p13 = scmp.ne.s32.totalorder %s54_s30, %s3983_s0  ;;  %p3989_p1 = scmp.lt.s32.totalorder %s3983_s0, %s3983_s0 }
  0x41   :  { %p3990_p2 = por %p3989_p1, %p3988_p0 }
  0x43   :  { %p3991_p3 = pnand %p3990_p2, %p3984_p13 }
  0x45   :  { %3994 = shalt.err (!%p3991_p3)
}
  0x46   :  { %59 = dma.hbm_to_vmem [thread:$0]  %s4554_s2, 4096, %s54_s30, [#allocation7], %s4076_s5, %s4076_s5, %s4077_s28  }
  0x47   :  { %s3995_s25 = scalar_lea.hbm %s4561_s9, 1024 }
  0x48   :  { %p3996_p4 = scmp.ne.s32.totalorder %s4561_s9, %s3995_s25  ;;  %p3999_p5 = scmp.lt.u32.totalorder %s3995_s25, %s4561_s9 }
  0x4a   :  { %p4001_p6 = pnand %p3999_p5, %p3996_p4 }
  0x4c   :  { %4004 = shalt.err (!%p4001_p6)
}
  0x4d   :  { %s4005_s18 = scalar_lea.vmem %s88_s26, 1024  ;;  %p4010_p8 = scmp.lt.s32.totalorder %s88_s26, %s88_s26 }
  0x4e   :  { %p4006_p7 = scmp.ne.s32.totalorder %s88_s26, %s4005_s18  ;;  %p4011_p9 = scmp.lt.s32.totalorder %s4005_s18, %s4005_s18 }
  0x50   :  { %p4012_p10 = por %p4011_p9, %p4010_p8 }
  0x52   :  { %p4013_p11 = pnand %p4012_p10, %p4006_p7 }
  0x54   :  { %4016 = shalt.err (!%p4013_p11)
}
  0x55   :  { %93 = dma.hbm_to_vmem [thread:$0]  %s4561_s9, 1024, %s88_s26, [#allocation10], %s4072_s23, %s4072_s23, %s4073_s24  }
  0x56   :  { %s4080_s28 = smov [#allocation12]   ;;  %s4017_s0 = scalar_lea.hbm %s4564_s12, 1024 }
  0x57   :  { %s103_s30 = sshll.u32 %s4080_s28, 4  ;;  %p4018_p12 = scmp.ne.s32.totalorder %s4564_s12, %s4017_s0  ;;  %s104_s30 = int_to_ptr.vmem [resolvable:$true] %s103_s30 }
  0x58   :  { %p4021_p13 = scmp.lt.u32.totalorder %s4017_s0, %s4564_s12 }
  0x5a   :  { %p4023_p0 = pnand %p4021_p13, %p4018_p12 }
  0x5c   :  { %4026 = shalt.err (!%p4023_p0)
}
  0x5d   :  { %s4027_s25 = scalar_lea.vmem %s104_s30, 1024  ;;  %p4032_p2 = scmp.lt.s32.totalorder %s104_s30, %s104_s30 }
  0x5e   :  { %p4028_p1 = scmp.ne.s32.totalorder %s104_s30, %s4027_s25  ;;  %p4033_p3 = scmp.lt.s32.totalorder %s4027_s25, %s4027_s25 }
  0x60   :  { %p4034_p4 = por %p4033_p3, %p4032_p2 }
  0x62   :  { %p4035_p5 = pnand %p4034_p4, %p4028_p1 }
  0x64   :  { %4038 = shalt.err (!%p4035_p5)
}
  0x65   :  { %109 = dma.hbm_to_vmem [thread:$0]  %s4564_s12, 1024, %s104_s30, [#allocation13], %s4072_s23, %s4072_s23, %s4073_s24  }
  0x66   :  { %4061 = dma.done.wait [#allocation4], 256  }
  0x67   :  { %4062 = vsyncadd [#allocation4], 4294967040 }
  0x68   :  { %4063 = dma.done.wait [#allocation7], 12288  }
  0x69   :  { %4064 = vsyncadd [#allocation7], 4294955008 }
  0x6a   :  { %4065 = dma.done.wait [#allocation10], 11264  }
  0x6b   :  { %4066 = vsyncadd [#allocation10], 4294956032 }
  0x6c   :  { %4067 = dma.done.wait [#allocation13], 1024  }
  0x6d   :  { %4068 = vsyncadd [#allocation13], 4294966272  ;;  %v4081_v0 = vmov 0.0   ;;  %vm4082_vm0 = vmmov 0   ;;  %v3685_v1 = vld [vmem:[#allocation6 + $0x40] sm:$0xff]   ;;  %v3686_v2 = vld [vmem:[#allocation6 + $0x48] sm:$0xff]  }
  0x6e   :  { %3215 = vmatprep.subr.bf16.mxu0 %v4081_v0  ;;  %131 = vst [vmem:[#allocation2] sm:$0xff] %v4081_v0  ;;  %132 = vst [vmem:[#allocation2 + $0x10] sm:$0xff] %v4081_v0  ;;  %3231 = vmatprep.mubr.msk.bf16.mxu0 %vm4082_vm0, %v4081_v0  ;;  %v3687_v3 = vld [vmem:[#allocation6 + $0x50] sm:$0xff]   ;;  %v4256_v5 = vld [vmem:[#allocation3 + $0x8] sm:$0xff]  ;;  %v4083_v53 = vmov 0   ;;  %vm2714_vm1 = vcmask 1041409  }
  0x6f   :  { %3295 = vmatprep.subr.bf16.mxu1 %v4081_v0  ;;  %3311 = vmatprep.mubr.msk.bf16.mxu1 %vm4082_vm0, %v4081_v0  ;;  %v4254_v4 = vld [vmem:[#allocation3] sm:$0xff]  ;;  %136 = vst [vmem:[#allocation2 + $0x18] sm:$0xff] %v4256_v5  ;;  %v3688_v6 = vld [vmem:[#allocation6 + $0x58] sm:$0xff]   ;;  %v3689_v7 = vld [vmem:[#allocation6 + $0x60] sm:$0xff]   ;;  %s4084_s25 = smov [#allocation14]  }
  0x70   :  { %3216 = vmatpush3.bf16.msra.mxu0 %v3685_v1  ;;  %135 = vst [vmem:[#allocation2 + $0x8] sm:$0xff] %v4254_v4  ;;  %v3690_v8 = vld [vmem:[#allocation6 + $0x68] sm:$0xff]   ;;  %v3691_v9 = vld [vmem:[#allocation6 + $0x70] sm:$0xff]   ;;  %v3692_v10 = vld [vmem:[#allocation6 + $0x78] sm:$0xff]   ;;  %v151_v15 = vpack.c.bf16 %v4256_v5, %v4254_v4  ;;  %s2813_s9 = sshll.u32 %s4084_s25, 4  ;;  %s2814_s9 = int_to_ptr.vmem [resolvable:$true] %s2813_s9 }
  0x71   :  { %3217 = vmatprep.subr.bf16.mxu0 %v4081_v0  ;;  %v3693_v14 = vld [vmem:[#allocation6] sm:$0xff]   ;;  %v3694_v16 = vld [vmem:[#allocation6 + $0x8] sm:$0xff]   ;;  %v3695_v17 = vld [vmem:[#allocation6 + $0x10] sm:$0xff]   ;;  %s4039_s26 = scalar_lea.vmem %s2814_s9, 32  ;;  %p4044_p7 = scmp.lt.s32.totalorder %s2814_s9, %s2814_s9 }
  0x72   :  { %v3696_v18 = vld [vmem:[#allocation6 + $0x18] sm:$0xff]   ;;  %v3697_v19 = vld [vmem:[#allocation6 + $0x20] sm:$0xff]   ;;  %v3698_v20 = vld [vmem:[#allocation6 + $0x28] sm:$0xff]   ;;  %p4040_p6 = scmp.ne.s32.totalorder %s2814_s9, %s4039_s26  ;;  %p4045_p8 = scmp.lt.s32.totalorder %s4039_s26, %s4039_s26 }
  0x73   :  { %v3699_v21 = vld [vmem:[#allocation6 + $0x30] sm:$0xff]   ;;  %v3700_v22 = vld [vmem:[#allocation6 + $0x38] sm:$0xff]   ;;  %v3701_v25 = vld [vmem:[#allocation6 + $0x80] sm:$0xff]  }
  0x74   :  { %3218 = vmatpush3.bf16.msra.mxu0 %v3686_v2  ;;  %v3702_v27 = vld [vmem:[#allocation6 + $0x88] sm:$0xff]   ;;  %v3703_v28 = vld [vmem:[#allocation6 + $0x90] sm:$0xff]   ;;  %v3704_v29 = vld [vmem:[#allocation6 + $0x98] sm:$0xff]   ;;  %p4046_p9 = por %p4045_p8, %p4044_p7 }
  0x75   :  { %3219 = vmatprep.subr.bf16.mxu0 %v4081_v0  ;;  %v3705_v30 = vld [vmem:[#allocation6 + $0xa0] sm:$0xff]   ;;  %v3706_v31 = vld [vmem:[#allocation6 + $0xa8] sm:$0xff]   ;;  %v3707_v32 = vld [vmem:[#allocation6 + $0xb0] sm:$0xff]  }
  0x76   :  { %v141_v12 = vld [vmem:[#allocation2 + $0x15] sm:$0xff]  ;;  %v3708_v33 = vld [vmem:[#allocation6 + $0xb8] sm:$0xff]   ;;  %v3711_v39 = vld [vmem:[#allocation6 + $0xd0] sm:$0xff]   ;;  %p4047_p10 = pnand %p4046_p9, %p4040_p6 }
  0x77   :  { %v140_v11 = vld [vmem:[#allocation2 + $0x5] sm:$0xff]  ;;  %v138_v24 = vld [vmem:[#allocation2 + $0x14] sm:$0xff] }
  0x78   :  { %3220 = vmatpush3.bf16.msra.mxu0 %v3687_v3  ;;  %v142_v13 = vpack.c.bf16 %v141_v12, %v140_v11  ;;  %v137_v23 = vld [vmem:[#allocation2 + $0x4] sm:$0xff]  ;;  %v144_v35 = vld [vmem:[#allocation2 + $0x16] sm:$0xff] }
  0x79   :  { %3221 = vmatprep.subr.bf16.mxu0 %v4081_v0  ;;  %v139_v26 = vpack.c.bf16 %v138_v24, %v137_v23  ;;  %v143_v34 = vld [vmem:[#allocation2 + $0x6] sm:$0xff]  ;;  %v3709_v36 = vld [vmem:[#allocation6 + $0xc0] sm:$0xff]   ;;  %v3710_v38 = vld [vmem:[#allocation6 + $0xc8] sm:$0xff]  }
  0x7a   :  { %v145_v37 = vpack.c.bf16 %v144_v35, %v143_v34  ;;  %v3712_v40 = vld [vmem:[#allocation6 + $0xd8] sm:$0xff]   ;;  %v3713_v41 = vld [vmem:[#allocation6 + $0xe0] sm:$0xff]   ;;  %v3714_v42 = vld [vmem:[#allocation6 + $0xe8] sm:$0xff]  }
  0x7b   :  { %v3715_v43 = vld [vmem:[#allocation6 + $0xf0] sm:$0xff]   ;;  %v3716_v44 = vld [vmem:[#allocation6 + $0xf8] sm:$0xff]   ;;  %v147_v46 = vld [vmem:[#allocation2 + $0x17] sm:$0xff] }
  0x7c   :  { %3222 = vmatpush3.bf16.msra.mxu0 %v3688_v6  ;;  %v146_v45 = vld [vmem:[#allocation2 + $0x7] sm:$0xff]  ;;  %v3719_v47 = vld [vmem:[#allocation8 + $0x4] ss:$8 sps:$4 sm:$0xff]   ;;  %v3717_v48 = vld [vmem:[#allocation8] ss:$8 sps:$4 sm:$0xff]  }
  0x7d   :  { %3223 = vmatprep.subr.bf16.mxu0 %v4081_v0  ;;  %v148_v49 = vpack.c.bf16 %v147_v46, %v146_v45  ;;  %v3722_v50 = vld [vmem:[#allocation8 + $0x14] ss:$8 sps:$4 sm:$0xff]   ;;  %v3720_v51 = vld [vmem:[#allocation8 + $0x10] ss:$8 sps:$4 sm:$0xff]   ;;  %v3725_v52 = vld [vmem:[#allocation8 + $0x24] ss:$8 sps:$4 sm:$0xff]  }
  0x7e   :  { %v3723_v54 = vld [vmem:[#allocation8 + $0x20] ss:$8 sps:$4 sm:$0xff]   ;;  %v3728_v55 = vld [vmem:[#allocation8 + $0x34] ss:$8 sps:$4 sm:$0xff]   ;;  %v3726_v56 = vld [vmem:[#allocation8 + $0x30] ss:$8 sps:$4 sm:$0xff]  }
  0x7f   :  { %v3731_v57 = vld [vmem:[#allocation8 + $0x44] ss:$8 sps:$4 sm:$0xff]   ;;  %v3729_v58 = vld [vmem:[#allocation8 + $0x40] ss:$8 sps:$4 sm:$0xff]   ;;  %v3734_v59 = vld [vmem:[#allocation8 + $0x54] ss:$8 sps:$4 sm:$0xff]  }
  0x80   :  { %3224 = vmatpush3.bf16.msra.mxu0 %v3689_v7  ;;  %v3732_v60 = vld [vmem:[#allocation8 + $0x50] ss:$8 sps:$4 sm:$0xff]   ;;  %v3737_v61 = vld [vmem:[#allocation8 + $0x64] ss:$8 sps:$4 sm:$0xff]   ;;  %v3735_v62 = vld [vmem:[#allocation8 + $0x60] ss:$8 sps:$4 sm:$0xff]  }
  0x81   :  { %3225 = vmatprep.subr.bf16.mxu0 %v4081_v0  ;;  %v3740_v63 = vld [vmem:[#allocation8 + $0x74] ss:$8 sps:$4 sm:$0xff]   ;;  %v3738_v1 = vld [vmem:[#allocation8 + $0x70] ss:$8 sps:$4 sm:$0xff]   ;;  %v3741_v3 = vld [vmem:[#allocation9 + $0x40] sm:$0xff]  }
  0x82   :  { %v4302_v2 = vld [vmem:[#allocation2] sm:$0xff]  ;;  %3296 = vmatpush3.bf16.msra.mxu1 %v3741_v3  ;;  %v3742_v6 = vld [vmem:[#allocation9 + $0x48] sm:$0xff]   ;;  %v3745_v4 = vld [vmem:[#allocation9 + $0x60] sm:$0xff]  }
  0x83   :  { %3297 = vmatprep.subr.bf16.mxu1 %v4302_v2  ;;  %v3743_v7 = vld [vmem:[#allocation9 + $0x50] sm:$0xff]   ;;  %v3746_v5 = vld [vmem:[#allocation9 + $0x68] sm:$0xff]   ;;  %v3757_v45 = vld [vmem:[#allocation9 + $0x80] sm:$0xff]  }
  0x84   :  { %3226 = vmatpush3.bf16.msra.mxu0 %v3690_v8  ;;  %v3747_v8 = vld [vmem:[#allocation9 + $0x70] sm:$0xff]   ;;  %v3750_v34 = vld [vmem:[#allocation9 + $0x8] sm:$0xff]   ;;  %v3772_v3 = vld [vmem:[#allocation9 + $0xf8] sm:$0xff]  }
  0x85   :  { %3227 = vmatprep.subr.bf16.mxu0 %v4081_v0  ;;  %v3785_v35 = vld [vmem:[#allocation6 + $0x148] sm:$0xff]  }
  0x86   :  { %3298 = vmatpush3.bf16.msra.mxu1 %v3742_v6 }
  0x87   :  { %3299 = vmatprep.subr.bf16.mxu1 %v4302_v2 }
  0x88   :  { %3228 = vmatpush3.bf16.msra.mxu0 %v3691_v9  ;;  %v3748_v9 = vld [vmem:[#allocation9 + $0x78] sm:$0xff]  }
  0x89   :  { %3229 = vmatprep.subr.bf16.mxu0 %v4081_v0 }
  0x8a   :  { %3300 = vmatpush3.bf16.msra.mxu1 %v3743_v7 }
  0x8b   :  { %3301 = vmatprep.subr.bf16.mxu1 %v4302_v2 }
  0x8c   :  { %3230 = vmatpush3.bf16.msra.mxu0 %v3692_v10 }
  0x8d   :  { %3235 = vmatprep.subr.bf16.mxu0 %v4081_v0 }
  0x8f   :  { %3232 = vmatmul.mubr.bf16.vlgmr.msra.gmra.mrb[0].mxu0 %v142_v13 }
  0x90   :  { %3236 = vmatpush3.bf16.msra.mxu0 %v3693_v14  ;;  %3251 = vmatprep.mubr.msk.bf16.mxu0 %vm4082_vm0, %v4081_v0 }
  0x91   :  { %3237 = vmatprep.subr.bf16.mxu0 %v4081_v0 }
  0x94   :  { %3238 = vmatpush3.bf16.msra.mxu0 %v3694_v16 }
  0x95   :  { %3239 = vmatprep.subr.bf16.mxu0 %v4081_v0 }
  0x98   :  { %3240 = vmatpush3.bf16.msra.mxu0 %v3695_v17 }
  0x99   :  { %3241 = vmatprep.subr.bf16.mxu0 %v4081_v0 }
  0x9c   :  { %3242 = vmatpush3.bf16.msra.mxu0 %v3696_v18  ;;  %v2875_v18 = vld [vmem:[%s4556_s4] ss:$0 sm:$0xff] }
  0x9d   :  { %3243 = vmatprep.subr.bf16.mxu0 %v4081_v0 }
  0xa0   :  { %3244 = vmatpush3.bf16.msra.mxu0 %v3697_v19 }
  0xa1   :  { %3245 = vmatprep.subr.bf16.mxu0 %v4081_v0 }
  0xa4   :  { %3246 = vmatpush3.bf16.msra.mxu0 %v3698_v20 }
  0xa5   :  { %3247 = vmatprep.subr.bf16.mxu0 %v4081_v0 }
  0xa8   :  { %3248 = vmatpush3.bf16.msra.mxu0 %v3699_v21 }
  0xa9   :  { %3249 = vmatprep.subr.bf16.mxu0 %v4081_v0 }
  0xac   :  { %3250 = vmatpush3.bf16.msra.mxu0 %v3700_v22 }
  0xad   :  { %3255 = vmatprep.subr.bf16.mxu0 %v4081_v0 }
  0xaf   :  { %3252 = vmatmul.mubr.bf16.vlgmr.msra.gmra.mrb[0].mxu0 %v139_v26 }
  0xb0   :  { %3256 = vmatpush3.bf16.msra.mxu0 %v3701_v25  ;;  %3271 = vmatprep.mubr.msk.bf16.mxu0 %vm4082_vm0, %v4081_v0 }
  0xb1   :  { %3257 = vmatprep.subr.bf16.mxu0 %v4081_v0 }
  0xb4   :  { %3258 = vmatpush3.bf16.msra.mxu0 %v3702_v27 }
  0xb5   :  { %3259 = vmatprep.subr.bf16.mxu0 %v4081_v0 }
  0xb8   :  { %3260 = vmatpush3.bf16.msra.mxu0 %v3703_v28 }
  0xb9   :  { %3261 = vmatprep.subr.bf16.mxu0 %v4081_v0 }
  0xbc   :  { %3262 = vmatpush3.bf16.msra.mxu0 %v3704_v29 }
  0xbd   :  { %3263 = vmatprep.subr.bf16.mxu0 %v4081_v0 }
  0xc0   :  { %3264 = vmatpush3.bf16.msra.mxu0 %v3705_v30 }
  0xc1   :  { %3265 = vmatprep.subr.bf16.mxu0 %v4081_v0 }
  0xc4   :  { %3266 = vmatpush3.bf16.msra.mxu0 %v3706_v31  ;;  %v3749_v31 = vld [vmem:[#allocation9] sm:$0xff]  }
  0xc5   :  { %3267 = vmatprep.subr.bf16.mxu0 %v4081_v0 }
  0xc8   :  { %3268 = vmatpush3.bf16.msra.mxu0 %v3707_v32 }
  0xc9   :  { %3269 = vmatprep.subr.bf16.mxu0 %v4081_v0 }
  0xcc   :  { %3270 = vmatpush3.bf16.msra.mxu0 %v3708_v33  ;;  %v3781_v33 = vld [vmem:[#allocation6 + $0x140] sm:$0xff]  }
  0xcd   :  { %3275 = vmatprep.subr.bf16.mxu0 %v4081_v0 }
  0xcf   :  { %3272 = vmatmul.mubr.bf16.vlgmr.msra.gmra.mrb[0].mxu0 %v145_v37  ;;  %v3789_v37 = vld [vmem:[#allocation6 + $0x150] sm:$0xff]  }
  0xd0   :  { %3276 = vmatpush3.bf16.msra.mxu0 %v3709_v36  ;;  %3291 = vmatprep.mubr.msk.bf16.mxu0 %vm4082_vm0, %v4081_v0  ;;  %v3751_v36 = vld [vmem:[#allocation9 + $0x10] sm:$0xff]  }
  0xd1   :  { %3277 = vmatprep.subr.bf16.mxu0 %v4081_v0 }
  0xd4   :  { %3278 = vmatpush3.bf16.msra.mxu0 %v3710_v38  ;;  %v3752_v38 = vld [vmem:[#allocation9 + $0x18] sm:$0xff]  }
  0xd5   :  { %3279 = vmatprep.subr.bf16.mxu0 %v4081_v0 }
  0xd8   :  { %3280 = vmatpush3.bf16.msra.mxu0 %v3711_v39  ;;  %v3753_v39 = vld [vmem:[#allocation9 + $0x20] sm:$0xff]  }
  0xd9   :  { %3281 = vmatprep.subr.bf16.mxu0 %v4081_v0 }
  0xdc   :  { %3282 = vmatpush3.bf16.msra.mxu0 %v3712_v40  ;;  %v3754_v40 = vld [vmem:[#allocation9 + $0x28] sm:$0xff]  }
  0xdd   :  { %3283 = vmatprep.subr.bf16.mxu0 %v4081_v0 }
  0xe0   :  { %3284 = vmatpush3.bf16.msra.mxu0 %v3713_v41  ;;  %v3755_v41 = vld [vmem:[#allocation9 + $0x30] sm:$0xff]  }
  0xe1   :  { %3285 = vmatprep.subr.bf16.mxu0 %v4081_v0 }
  0xe4   :  { %3286 = vmatpush3.bf16.msra.mxu0 %v3714_v42  ;;  %v3756_v42 = vld [vmem:[#allocation9 + $0x38] sm:$0xff]  }
  0xe5   :  { %3287 = vmatprep.subr.bf16.mxu0 %v4081_v0 }
  0xe8   :  { %3288 = vmatpush3.bf16.msra.mxu0 %v3715_v43 }
  0xe9   :  { %3289 = vmatprep.subr.bf16.mxu0 %v4081_v0 }
  0xec   :  { %3290 = vmatpush3.bf16.msra.mxu0 %v3716_v44 }
  0xed   :  { %672 = vmatprep.subr.bf16.mxu0 %v3719_v47  ;;  %v3758_v47 = vld [vmem:[#allocation9 + $0x88] sm:$0xff]  }
  0xef   :  { %3292 = vmatmul.mubr.bf16.vlgmr.msra.gmra.mrb[0].mxu0 %v148_v49  ;;  %v3760_v49 = vld [vmem:[#allocation9 + $0x98] sm:$0xff]  }
  0xf0   :  { %673 = vmatpush1.bf16.msra.mxu0 %v3717_v48  ;;  %704 = vmatprep.mubr.bf16.mxu0 %v4083_v53  ;;  %v3759_v48 = vld [vmem:[#allocation9 + $0x90] sm:$0xff]  }
  0xf1   :  { %674 = vmatprep.subr.bf16.mxu0 %v3722_v50  ;;  %v3761_v50 = vld [vmem:[#allocation9 + $0xa0] sm:$0xff]  }
  0xf4   :  { %675 = vmatpush1.bf16.msra.mxu0 %v3720_v51  ;;  %v3762_v51 = vld [vmem:[#allocation9 + $0xa8] sm:$0xff]  }
  0xf5   :  { %676 = vmatprep.subr.bf16.mxu0 %v3725_v52  ;;  %v3763_v52 = vld [vmem:[#allocation9 + $0xb0] sm:$0xff]  }
  0xf8   :  { %677 = vmatpush1.bf16.msra.mxu0 %v3723_v54  ;;  %v3764_v54 = vld [vmem:[#allocation9 + $0xb8] sm:$0xff]  }
  0xf9   :  { %678 = vmatprep.subr.bf16.mxu0 %v3728_v55 }
  0xfc   :  { %679 = vmatpush1.bf16.msra.mxu0 %v3726_v56 }
  0xfd   :  { %680 = vmatprep.subr.bf16.mxu0 %v3731_v57  ;;  %v3765_v57 = vld [vmem:[#allocation9 + $0xc0] sm:$0xff]  }
 0x100   :  { %681 = vmatpush1.bf16.msra.mxu0 %v3729_v58 }
 0x101   :  { %682 = vmatprep.subr.bf16.mxu0 %v3734_v59  ;;  %v3766_v59 = vld [vmem:[#allocation9 + $0xc8] sm:$0xff]  }
 0x104   :  { %683 = vmatpush1.bf16.msra.mxu0 %v3732_v60  ;;  %v3767_v60 = vld [vmem:[#allocation9 + $0xd0] sm:$0xff]  }
 0x105   :  { %684 = vmatprep.subr.bf16.mxu0 %v3737_v61  ;;  %v3768_v61 = vld [vmem:[#allocation9 + $0xd8] sm:$0xff]  }
 0x108   :  { %685 = vmatpush1.bf16.msra.mxu0 %v3735_v62  ;;  %v3769_v62 = vld [vmem:[#allocation9 + $0xe0] sm:$0xff]  }
 0x109   :  { %686 = vmatprep.subr.bf16.mxu0 %v3740_v63  ;;  %v3770_v63 = vld [vmem:[#allocation9 + $0xe8] sm:$0xff]  }
 0x10c   :  { %687 = vmatpush1.bf16.msra.mxu0 %v3738_v1  ;;  %v3771_v1 = vld [vmem:[#allocation9 + $0xf0] sm:$0xff]  }
 0x10d   :  { %3395 = vmatprep.subr.bf16.mxu0 %v4081_v0  ;;  %v3744_v0 = vld [vmem:[#allocation9 + $0x58] sm:$0xff]  }
 0x10e   :  { %3302 = vmatpush3.bf16.msra.mxu1 %v3744_v0  ;;  %v3773_v0 = vld [vmem:[#allocation9 + $0x100] sm:$0xff]  }
 0x10f   :  { %705 = vmatmul.mubr.bf16.vlgmr.msra.gmra.mrb[4].mxu0 %v151_v15  ;;  %3303 = vmatprep.subr.bf16.mxu1 %v4302_v2  ;;  %v2874_v15 = vld [vmem:[%s4555_s3] ss:$0 sm:$0xff] }
 0x110   :  { %3411 = vmatprep.mubr.msk.bf16.mxu0 %vm4082_vm0, %v4302_v2  ;;  %3396 = vmatpush3.bf16.msra.mxu0 %v3781_v33  ;;  %v3810_v33 = vld [vmem:[#allocation8 + $0xf0] ss:$8 sps:$4 sm:$0xff]  }
 0x111   :  { %3397 = vmatprep.subr.bf16.mxu0 %v4302_v2 }
 0x112   :  { %3304 = vmatpush3.bf16.msra.mxu1 %v3745_v4 }
 0x113   :  { %3305 = vmatprep.subr.bf16.mxu1 %v4302_v2 }
 0x114   :  { %3398 = vmatpush3.bf16.msra.mxu0 %v3785_v35  ;;  %v3809_v35 = vld [vmem:[#allocation6 + $0x178] sm:$0xff]  }
 0x115   :  { %3399 = vmatprep.subr.bf16.mxu0 %v4302_v2 }
 0x116   :  { %3306 = vmatpush3.bf16.msra.mxu1 %v3746_v5  ;;  %v3774_v5 = vld [vmem:[#allocation9 + $0x108] sm:$0xff]  }
 0x117   :  { %3307 = vmatprep.subr.bf16.mxu1 %v4302_v2 }
 0x118   :  { %3400 = vmatpush3.bf16.msra.mxu0 %v3789_v37 }
 0x119   :  { %3401 = vmatprep.subr.bf16.mxu0 %v4302_v2 }
 0x11a   :  { %3308 = vmatpush3.bf16.msra.mxu1 %v3747_v8  ;;  %v3775_v8 = vld [vmem:[#allocation9 + $0x110] sm:$0xff]  }
 0x11b   :  { %3309 = vmatprep.subr.bf16.mxu1 %v4302_v2 }
 0x11e   :  { %3310 = vmatpush3.bf16.msra.mxu1 %v3748_v9  ;;  %v3776_v9 = vld [vmem:[#allocation9 + $0x118] sm:$0xff]  }
 0x11f   :  { %3315 = vmatprep.subr.bf16.mxu1 %v4302_v2 }
 0x1c2   :  { %v567_v10 = vpop.f32.mrb[0].mxu0 }
 0x1c3   :  { %v3293_v11 = vpop.f32.mrb[1].mxu0 }
 0x1c4   :  { %v570_v12 = vpop.f32.mrb[2].mxu0  ;;  %v3778_v11 = vld [vmem:[#allocation9 + $0x128] sm:$0xff]  }
 0x1c5   :  { %v3294_v13 = vpop.f32.mrb[3].mxu0 }
 0x1c6   :  { %v3780_v13 = vld [vmem:[#allocation9 + $0x138] sm:$0xff]  }
 0x1e2   :  { %v706_v14 = vpop.f32.mrb[4].mxu0 }
 0x1e3   :  { %v715_v16 = vadd.f32 %v706_v14, %v567_v10  ;;  %v4317_v17 = vpop.f32.mrb[5].mxu0  ;;  %v3777_v10 = vld [vmem:[#allocation9 + $0x120] sm:$0xff]  }
 0x1e4   :  { %v710_v19 = vpop.f32.mrb[6].mxu0  ;;  %v3784_v14 = vld [vmem:[#allocation8 + $0x84] ss:$8 sps:$4 sm:$0xff]  }
 0x1e5   :  { %v733_v20 = vmul.f32 %v2874_v15, %v715_v16  ;;  %v716_v21 = vadd.f32 %v710_v19, %v570_v12  ;;  %v4322_v22 = vpop.f32.mrb[7].mxu0  ;;  %v3779_v12 = vld [vmem:[#allocation9 + $0x130] sm:$0xff]   ;;  %v3792_v19 = vld [vmem:[#allocation8 + $0xa4] ss:$8 sps:$4 sm:$0xff]  }
 0x1e6   :  { %v3788_v16 = vld [vmem:[#allocation8 + $0x94] ss:$8 sps:$4 sm:$0xff]  }
 0x1e7   :  { %v742_v23 = vadd.f32 %v2875_v18, %v733_v20  ;;  %v734_v24 = vmul.f32 %v2874_v15, %v716_v21  ;;  %v3782_v15 = vld [vmem:[#allocation8 + $0x80] ss:$8 sps:$4 sm:$0xff]   ;;  %v3796_v21 = vld [vmem:[#allocation8 + $0xb4] ss:$8 sps:$4 sm:$0xff]  }
 0x1e8   :  { %v3790_v20 = vld [vmem:[#allocation8 + $0xa0] ss:$8 sps:$4 sm:$0xff]  }
 0x1e9   :  { %v744_v25 = vmax.f32 %v742_v23, 0.0  ;;  %v743_v26 = vadd.f32 %v2875_v18, %v734_v24  ;;  %v3786_v18 = vld [vmem:[#allocation8 + $0x90] ss:$8 sps:$4 sm:$0xff]   ;;  %v3800_v24 = vld [vmem:[#allocation8 + $0xc4] ss:$8 sps:$4 sm:$0xff]  }
 0x1ea   :  { %v3794_v23 = vld [vmem:[#allocation8 + $0xb0] ss:$8 sps:$4 sm:$0xff]  }
 0x1eb   :  { %746 = vst [vmem:[#allocation2 + $0x8] sm:$0xff] %v744_v25  ;;  %v745_v27 = vmax.f32 %v743_v26, 0.0  ;;  %v3793_v26 = vld [vmem:[#allocation6 + $0x158] sm:$0xff]  }
 0x1ec   :  { %3402 = vmatpush3.bf16.msra.mxu0 %v3793_v26  ;;  %v3839_v26 = vld [vmem:[#allocation9 + $0x190] sm:$0xff]  }
 0x1ed   :  { %747 = vst [vmem:[#allocation2 + $0x18] sm:$0xff] %v745_v27  ;;  %v4324_v28 = vpack.c.bf16 %v745_v27, %v744_v25  ;;  %v3798_v25 = vld [vmem:[#allocation8 + $0xc0] ss:$8 sps:$4 sm:$0xff]   ;;  %v3804_v27 = vld [vmem:[#allocation8 + $0xd4] ss:$8 sps:$4 sm:$0xff]   ;;  %3403 = vmatprep.subr.bf16.mxu0 %v4302_v2 }
 0x1f2   :  { %v751_v29 = vld [vmem:[#allocation2 + $0x5] sm:$0xff] }
 0x1f3   :  { %v748_v44 = vld [vmem:[#allocation2 + $0x4] sm:$0xff] }
 0x1f4   :  { %v752_v30 = vld [vmem:[#allocation2 + $0x15] sm:$0xff]  ;;  %v754_v56 = vld [vmem:[#allocation2 + $0x6] sm:$0xff] }
 0x1f5   :  { %v753_v32 = vpack.c.bf16 %v752_v30, %v751_v29  ;;  %v749_v43 = vld [vmem:[#allocation2 + $0x14] sm:$0xff]  ;;  %v757_v7 = vld [vmem:[#allocation2 + $0x7] sm:$0xff] }
 0x1f6   :  { %v750_v46 = vpack.c.bf16 %v749_v43, %v748_v44  ;;  %v755_v55 = vld [vmem:[#allocation2 + $0x16] sm:$0xff] }
 0x1f7   :  { %3312 = vmatmul.mubr.bf16.vlgmr.msra.gmra.mrb[0].mxu1 %v753_v32  ;;  %v756_v58 = vpack.c.bf16 %v755_v55, %v754_v56  ;;  %v758_v6 = vld [vmem:[#allocation2 + $0x17] sm:$0xff]  ;;  %v3812_v32 = vld [vmem:[#allocation8 + $0xf4] ss:$8 sps:$4 sm:$0xff]  }
 0x1f8   :  { %3316 = vmatpush3.bf16.msra.mxu1 %v3749_v31  ;;  %3331 = vmatprep.mubr.msk.bf16.mxu1 %vm4082_vm0, %v4302_v2  ;;  %v759_v4 = vpack.c.bf16 %v758_v6, %v757_v7  ;;  %v3808_v29 = vld [vmem:[#allocation8 + $0xe4] ss:$8 sps:$4 sm:$0xff]   ;;  %v3806_v30 = vld [vmem:[#allocation8 + $0xe0] ss:$8 sps:$4 sm:$0xff]   ;;  %v4400_v6 = vpack.c.bf16 %v4302_v2, %v4302_v2 }
 0x1f9   :  { %3317 = vmatprep.subr.bf16.mxu1 %v4302_v2  ;;  %v3801_v31 = vld [vmem:[#allocation6 + $0x168] sm:$0xff]   ;;  %v3821_v7 = vld [vmem:[#allocation6 + $0x180] sm:$0xff]  }
 0x1fc   :  { %3318 = vmatpush3.bf16.msra.mxu1 %v3750_v34  ;;  %v3805_v34 = vld [vmem:[#allocation6 + $0x170] sm:$0xff]  }
 0x1fd   :  { %3319 = vmatprep.subr.bf16.mxu1 %v4302_v2 }
 0x200   :  { %3320 = vmatpush3.bf16.msra.mxu1 %v3751_v36  ;;  %v2916_v36 = vld [vmem:[%s4558_s6] ss:$0 sm:$0xff] }
 0x201   :  { %3321 = vmatprep.subr.bf16.mxu1 %v4302_v2 }
 0x204   :  { %3322 = vmatpush3.bf16.msra.mxu1 %v3752_v38  ;;  %v2917_v38 = vld [vmem:[%s4559_s7] ss:$0 sm:$0xff] }
 0x205   :  { %3323 = vmatprep.subr.bf16.mxu1 %v4302_v2 }
 0x208   :  { %3324 = vmatpush3.bf16.msra.mxu1 %v3753_v39 }
 0x209   :  { %3325 = vmatprep.subr.bf16.mxu1 %v4302_v2 }
 0x20c   :  { %3326 = vmatpush3.bf16.msra.mxu1 %v3754_v40 }
 0x20d   :  { %3327 = vmatprep.subr.bf16.mxu1 %v4302_v2 }
 0x210   :  { %3328 = vmatpush3.bf16.msra.mxu1 %v3755_v41  ;;  %v2873_v41 = vld [vmem:[%s4560_s8] ss:$0 sm:$0xff] }
 0x211   :  { %3329 = vmatprep.subr.bf16.mxu1 %v4302_v2 }
 0x214   :  { %3330 = vmatpush3.bf16.msra.mxu1 %v3756_v42 }
 0x215   :  { %3335 = vmatprep.subr.bf16.mxu1 %v4302_v2 }
 0x217   :  { %3332 = vmatmul.mubr.bf16.vlgmr.msra.gmra.mrb[0].mxu1 %v750_v46  ;;  %v724_v46 = vadd.f32 %v2873_v41, %v4317_v17 }
 0x218   :  { %3336 = vmatpush3.bf16.msra.mxu1 %v3757_v45  ;;  %3351 = vmatprep.mubr.msk.bf16.mxu1 %vm4082_vm0, %v4302_v2 }
 0x219   :  { %3337 = vmatprep.subr.bf16.mxu1 %v4302_v2 }
 0x21c   :  { %3338 = vmatpush3.bf16.msra.mxu1 %v3758_v47 }
 0x21d   :  { %3339 = vmatprep.subr.bf16.mxu1 %v4302_v2 }
 0x220   :  { %3340 = vmatpush3.bf16.msra.mxu1 %v3759_v48 }
 0x221   :  { %3341 = vmatprep.subr.bf16.mxu1 %v4302_v2 }
 0x224   :  { %3342 = vmatpush3.bf16.msra.mxu1 %v3760_v49  ;;  %v725_v49 = vadd.f32 %v2873_v41, %v4322_v22  ;;  %v3815_v22 = vld [vmem:[#allocation6 + $0x110] sm:$0xff]  }
 0x225   :  { %3343 = vmatprep.subr.bf16.mxu1 %v4302_v2 }
 0x228   :  { %3344 = vmatpush3.bf16.msra.mxu1 %v3761_v50 }
 0x229   :  { %3345 = vmatprep.subr.bf16.mxu1 %v4302_v2 }
 0x22c   :  { %3346 = vmatpush3.bf16.msra.mxu1 %v3762_v51 }
 0x22d   :  { %3347 = vmatprep.subr.bf16.mxu1 %v4302_v2 }
 0x230   :  { %3348 = vmatpush3.bf16.msra.mxu1 %v3763_v52 }
 0x231   :  { %3349 = vmatprep.subr.bf16.mxu1 %v4302_v2 }
 0x234   :  { %3350 = vmatpush3.bf16.msra.mxu1 %v3764_v54 }
 0x235   :  { %3355 = vmatprep.subr.bf16.mxu1 %v4302_v2 }
 0x237   :  { %3352 = vmatmul.mubr.bf16.vlgmr.msra.gmra.mrb[0].mxu1 %v756_v58 }
 0x238   :  { %3356 = vmatpush3.bf16.msra.mxu1 %v3765_v57  ;;  %3371 = vmatprep.mubr.msk.bf16.mxu1 %vm4082_vm0, %v4302_v2 }
 0x239   :  { %3357 = vmatprep.subr.bf16.mxu1 %v4302_v2 }
 0x23c   :  { %3358 = vmatpush3.bf16.msra.mxu1 %v3766_v59  ;;  %v3813_v59 = vld [vmem:[#allocation6 + $0x100] sm:$0xff]  }
 0x23d   :  { %3359 = vmatprep.subr.bf16.mxu1 %v4302_v2 }
 0x240   :  { %3360 = vmatpush3.bf16.msra.mxu1 %v3767_v60  ;;  %v3814_v60 = vld [vmem:[#allocation6 + $0x108] sm:$0xff]  }
 0x241   :  { %3361 = vmatprep.subr.bf16.mxu1 %v4302_v2 }
 0x244   :  { %3362 = vmatpush3.bf16.msra.mxu1 %v3768_v61  ;;  %v3816_v61 = vld [vmem:[#allocation6 + $0x118] sm:$0xff]  }
 0x245   :  { %3363 = vmatprep.subr.bf16.mxu1 %v4302_v2 }
 0x248   :  { %3364 = vmatpush3.bf16.msra.mxu1 %v3769_v62  ;;  %v3817_v62 = vld [vmem:[#allocation6 + $0x120] sm:$0xff]  }
 0x249   :  { %3365 = vmatprep.subr.bf16.mxu1 %v4302_v2 }
 0x24c   :  { %3366 = vmatpush3.bf16.msra.mxu1 %v3770_v63  ;;  %v3818_v63 = vld [vmem:[#allocation6 + $0x128] sm:$0xff]  }
 0x24d   :  { %3367 = vmatprep.subr.bf16.mxu1 %v4302_v2 }
 0x250   :  { %3368 = vmatpush3.bf16.msra.mxu1 %v3771_v1  ;;  %v3819_v1 = vld [vmem:[#allocation6 + $0x130] sm:$0xff]  }
 0x251   :  { %3369 = vmatprep.subr.bf16.mxu1 %v4302_v2 }
 0x254   :  { %3370 = vmatpush3.bf16.msra.mxu1 %v3772_v3  ;;  %v3820_v3 = vld [vmem:[#allocation6 + $0x138] sm:$0xff]  }
 0x255   :  { %3375 = vmatprep.subr.bf16.mxu1 %v4302_v2 }
 0x257   :  { %3372 = vmatmul.mubr.bf16.vlgmr.msra.gmra.mrb[0].mxu1 %v759_v4  ;;  %v3823_v4 = vld [vmem:[#allocation6 + $0x190] sm:$0xff]  }
 0x258   :  { %3376 = vmatpush3.bf16.msra.mxu1 %v3773_v0  ;;  %3391 = vmatprep.mubr.msk.bf16.mxu1 %vm4082_vm0, %v4302_v2  ;;  %v3822_v0 = vld [vmem:[#allocation6 + $0x188] sm:$0xff]  }
 0x259   :  { %3377 = vmatprep.subr.bf16.mxu1 %v4302_v2 }
 0x25c   :  { %3378 = vmatpush3.bf16.msra.mxu1 %v3774_v5  ;;  %v3824_v5 = vld [vmem:[#allocation6 + $0x198] sm:$0xff]  }
 0x25d   :  { %3379 = vmatprep.subr.bf16.mxu1 %v4302_v2 }
 0x260   :  { %3380 = vmatpush3.bf16.msra.mxu1 %v3775_v8  ;;  %v3825_v8 = vld [vmem:[#allocation6 + $0x1a0] sm:$0xff]  }
 0x261   :  { %3381 = vmatprep.subr.bf16.mxu1 %v4302_v2 }
 0x264   :  { %3382 = vmatpush3.bf16.msra.mxu1 %v3776_v9  ;;  %v3826_v9 = vld [vmem:[#allocation6 + $0x1a8] sm:$0xff]  }
 0x265   :  { %3383 = vmatprep.subr.bf16.mxu1 %v4302_v2 }
 0x268   :  { %3384 = vmatpush3.bf16.msra.mxu1 %v3777_v10  ;;  %v3827_v10 = vld [vmem:[#allocation6 + $0x1b0] sm:$0xff]  }
 0x269   :  { %3385 = vmatprep.subr.bf16.mxu1 %v4302_v2 }
 0x26c   :  { %3386 = vmatpush3.bf16.msra.mxu1 %v3778_v11  ;;  %v3828_v11 = vld [vmem:[#allocation6 + $0x1b8] sm:$0xff]  }
 0x26d   :  { %3387 = vmatprep.subr.bf16.mxu1 %v4302_v2 }
 0x270   :  { %3388 = vmatpush3.bf16.msra.mxu1 %v3779_v12 }
 0x271   :  { %3389 = vmatprep.subr.bf16.mxu1 %v4302_v2 }
 0x274   :  { %3390 = vmatpush3.bf16.msra.mxu1 %v3780_v13 }
 0x275   :  { %1857 = vmatprep.subr.bf16.mxu1 %v3784_v14  ;;  %v3829_v14 = vld [vmem:[#allocation6 + $0x1c0] sm:$0xff]  }
 0x277   :  { %3392 = vmatmul.mubr.bf16.vlgmr.msra.gmra.mrb[0].mxu1 %v4324_v28  ;;  %v3802_v28 = vld [vmem:[#allocation8 + $0xd0] ss:$8 sps:$4 sm:$0xff]  }
 0x278   :  { %1858 = vmatpush1.bf16.msra.mxu1 %v3782_v15  ;;  %1889 = vmatprep.mubr.bf16.mxu1 %v4083_v53  ;;  %v3797_v53 = vld [vmem:[#allocation6 + $0x160] sm:$0xff]  }
 0x279   :  { %1859 = vmatprep.subr.bf16.mxu1 %v3788_v16  ;;  %3404 = vmatpush3.bf16.msra.mxu0 %v3797_v53  ;;  %v3830_v16 = vld [vmem:[#allocation6 + $0x1c8] sm:$0xff]  }
 0x27a   :  { %3405 = vmatprep.subr.bf16.mxu0 %v4302_v2 }
 0x27c   :  { %1860 = vmatpush1.bf16.msra.mxu1 %v3786_v18  ;;  %v3831_v18 = vld [vmem:[#allocation6 + $0x1d0] sm:$0xff]  }
 0x27d   :  { %1861 = vmatprep.subr.bf16.mxu1 %v3792_v19  ;;  %3406 = vmatpush3.bf16.msra.mxu0 %v3801_v31  ;;  %v3832_v19 = vld [vmem:[#allocation6 + $0x1d8] sm:$0xff]   ;;  %v3841_v31 = vld [vmem:[#allocation9 + $0x1a0] sm:$0xff]  }
 0x27e   :  { %3407 = vmatprep.subr.bf16.mxu0 %v4302_v2 }
 0x280   :  { %1862 = vmatpush1.bf16.msra.mxu1 %v3790_v20  ;;  %v3833_v20 = vld [vmem:[#allocation6 + $0x1e0] sm:$0xff]  }
 0x281   :  { %1863 = vmatprep.subr.bf16.mxu1 %v3796_v21  ;;  %3408 = vmatpush3.bf16.msra.mxu0 %v3805_v34  ;;  %v3837_v21 = vld [vmem:[#allocation9 + $0x180] sm:$0xff]   ;;  %v3844_v34 = vld [vmem:[#allocation9 + $0x1b8] sm:$0xff]  }
 0x282   :  { %3409 = vmatprep.subr.bf16.mxu0 %v4302_v2 }
 0x284   :  { %1864 = vmatpush1.bf16.msra.mxu1 %v3794_v23  ;;  %v3834_v23 = vld [vmem:[#allocation6 + $0x1e8] sm:$0xff]  }
 0x285   :  { %1865 = vmatprep.subr.bf16.mxu1 %v3800_v24  ;;  %3410 = vmatpush3.bf16.msra.mxu0 %v3809_v35  ;;  %v3838_v24 = vld [vmem:[#allocation9 + $0x188] sm:$0xff]  }
 0x286   :  { %3415 = vmatprep.subr.bf16.mxu0 %v4302_v2 }
 0x288   :  { %1866 = vmatpush1.bf16.msra.mxu1 %v3798_v25  ;;  %v3835_v25 = vld [vmem:[#allocation6 + $0x1f0] sm:$0xff]  }
 0x289   :  { %1867 = vmatprep.subr.bf16.mxu1 %v3804_v27  ;;  %v3836_v27 = vld [vmem:[#allocation6 + $0x1f8] sm:$0xff]  }
 0x28c   :  { %1868 = vmatpush1.bf16.msra.mxu1 %v3802_v28 }
 0x28d   :  { %1869 = vmatprep.subr.bf16.mxu1 %v3808_v29 }
 0x290   :  { %1870 = vmatpush1.bf16.msra.mxu1 %v3806_v30  ;;  %v3840_v30 = vld [vmem:[#allocation9 + $0x198] sm:$0xff]  }
 0x291   :  { %1871 = vmatprep.subr.bf16.mxu1 %v3812_v32  ;;  %v3842_v32 = vld [vmem:[#allocation9 + $0x1a8] sm:$0xff]  }
 0x294   :  { %1872 = vmatpush1.bf16.msra.mxu1 %v3810_v33  ;;  %v3843_v33 = vld [vmem:[#allocation9 + $0x1b0] sm:$0xff]  }
 0x295   :  { %3475 = vmatprep.subr.bf16.mxu1 %v4302_v2 }
 0x34a   :  { %v1285_v37 = vpop.f32.mrb[0].mxu1 }
 0x34b   :  { %v1301_v39 = vmul.f32 %v2916_v36, %v1285_v37  ;;  %v3393_v40 = vpop.f32.mrb[1].mxu1 }
 0x34c   :  { %v1288_v42 = vpop.f32.mrb[2].mxu1  ;;  %v2969_v40 = vld [vmem:[%s4555_s3 + $0x1] ss:$0 sm:$0xff] }
 0x34d   :  { %v1310_v43 = vadd.f32 %v2917_v38, %v1301_v39  ;;  %v1302_v44 = vmul.f32 %v2916_v36, %v1288_v42  ;;  %v3394_v45 = vpop.f32.mrb[3].mxu1 }
 0x34f   :  { %v1312_v47 = vmax.f32 %v1310_v43, 0.0  ;;  %v1311_v48 = vadd.f32 %v2917_v38, %v1302_v44  ;;  %v2971_v43 = vld [vmem:[%s4556_s4 + $0x1] ss:$0 sm:$0xff] }
 0x351   :  { %v1314_v50 = vadd.f32 %v1312_v47, %v724_v46  ;;  %v1313_v51 = vmax.f32 %v1311_v48, 0.0 }
 0x353   :  { %v1316_v52 = vmax.f32 %v1314_v50, 0.0  ;;  %v1315_v54 = vadd.f32 %v1313_v51, %v725_v49 }
 0x355   :  { %1318 = vst [vmem:[#allocation2 + $0x8] sm:$0xff] %v1316_v52  ;;  %v1317_v55 = vmax.f32 %v1315_v54, 0.0 }
 0x357   :  { %1319 = vst [vmem:[#allocation2 + $0x18] sm:$0xff] %v1317_v55  ;;  %v1334_v56 = vpack.c.bf16 %v1317_v55, %v1316_v52 }
 0x359   :  { %1890 = vmatmul.mubr.bf16.vlgmr.msra.gmra.mrb[4].mxu1 %v1334_v56 }
 0x35a   :  { %3491 = vmatprep.mubr.msk.bf16.mxu1 %vm4082_vm0, %v4302_v2  ;;  %3476 = vmatpush3.bf16.msra.mxu1 %v3837_v21  ;;  %v3865_v21 = vld [vmem:[#allocation9 + $0x220] sm:$0xff]  }
 0x35b   :  { %3477 = vmatprep.subr.bf16.mxu1 %v4302_v2 }
 0x35c   :  { %v1323_v57 = vld [vmem:[#allocation2 + $0x2] sm:$0xff] }
 0x35d   :  { %v1326_v13 = vld [vmem:[#allocation2 + $0x4] sm:$0xff] }
 0x35e   :  { %v1324_v58 = vld [vmem:[#allocation2 + $0x12] sm:$0xff]  ;;  %3478 = vmatpush3.bf16.msra.mxu1 %v3838_v24  ;;  %v1329_v53 = vld [vmem:[#allocation2 + $0x6] sm:$0xff] }
 0x35f   :  { %v1325_v17 = vpack.c.bf16 %v1324_v58, %v1323_v57  ;;  %v1327_v12 = vld [vmem:[#allocation2 + $0x14] sm:$0xff]  ;;  %3479 = vmatprep.subr.bf16.mxu1 %v4302_v2  ;;  %v3867_v24 = vld [vmem:[#allocation9 + $0x230] sm:$0xff]  }
 0x360   :  { %v1328_v15 = vpack.c.bf16 %v1327_v12, %v1326_v13  ;;  %v1330_v28 = vld [vmem:[#allocation2 + $0x16] sm:$0xff]  ;;  %v3860_v12 = vld [vmem:[#allocation9 + $0x1f8] sm:$0xff]  }
 0x361   :  { %3412 = vmatmul.mubr.bf16.vlgmr.msra.gmra.mrb[8].mxu0 %v1325_v17  ;;  %v1331_v29 = vpack.c.bf16 %v1330_v28, %v1329_v53  ;;  %v3845_v57 = vld [vmem:[#allocation9 + $0x140] sm:$0xff]   ;;  %v3846_v17 = vld [vmem:[#allocation9 + $0x148] sm:$0xff]  }
 0x362   :  { %3416 = vmatpush3.bf16.msra.mxu0 %v3813_v59  ;;  %3431 = vmatprep.mubr.msk.bf16.mxu0 %vm4082_vm0, %v4302_v2  ;;  %v3877_v59 = vld [vmem:[#allocation11] sm:$0xff]  }
 0x363   :  { %3417 = vmatprep.subr.bf16.mxu0 %v4302_v2  ;;  %3480 = vmatpush3.bf16.msra.mxu1 %v3839_v26  ;;  %v3869_v28 = vld [vmem:[#allocation9 + $0x240] sm:$0xff]  }
 0x364   :  { %3481 = vmatprep.subr.bf16.mxu1 %v4302_v2 }
 0x366   :  { %3418 = vmatpush3.bf16.msra.mxu0 %v3814_v60  ;;  %v3878_v60 = vld [vmem:[#allocation11 + $0x8] sm:$0xff]  }
 0x367   :  { %3419 = vmatprep.subr.bf16.mxu0 %v4302_v2  ;;  %3482 = vmatpush3.bf16.msra.mxu1 %v3840_v30  ;;  %v3871_v30 = vld [vmem:[#allocation9 + $0x250] sm:$0xff]  }
 0x368   :  { %3483 = vmatprep.subr.bf16.mxu1 %v4302_v2 }
 0x36a   :  { %3420 = vmatpush3.bf16.msra.mxu0 %v3815_v22  ;;  %v3847_v22 = vld [vmem:[#allocation9 + $0x150] sm:$0xff]  }
 0x36b   :  { %3421 = vmatprep.subr.bf16.mxu0 %v4302_v2  ;;  %3484 = vmatpush3.bf16.msra.mxu1 %v3841_v31  ;;  %v3872_v31 = vld [vmem:[#allocation9 + $0x258] sm:$0xff]  }
 0x36c   :  { %3485 = vmatprep.subr.bf16.mxu1 %v4302_v2 }
 0x36e   :  { %3422 = vmatpush3.bf16.msra.mxu0 %v3816_v61  ;;  %v3879_v61 = vld [vmem:[#allocation11 + $0x10] sm:$0xff]  }
 0x36f   :  { %3423 = vmatprep.subr.bf16.mxu0 %v4302_v2  ;;  %3486 = vmatpush3.bf16.msra.mxu1 %v3842_v32  ;;  %v3873_v32 = vld [vmem:[#allocation9 + $0x260] sm:$0xff]  }
 0x370   :  { %3487 = vmatprep.subr.bf16.mxu1 %v4302_v2 }
 0x372   :  { %3424 = vmatpush3.bf16.msra.mxu0 %v3817_v62  ;;  %v3848_v62 = vld [vmem:[#allocation9 + $0x158] sm:$0xff]  }
 0x373   :  { %3425 = vmatprep.subr.bf16.mxu0 %v4302_v2  ;;  %3488 = vmatpush3.bf16.msra.mxu1 %v3843_v33  ;;  %v3874_v33 = vld [vmem:[#allocation9 + $0x268] sm:$0xff]  }
 0x374   :  { %3489 = vmatprep.subr.bf16.mxu1 %v4302_v2 }
 0x376   :  { %3426 = vmatpush3.bf16.msra.mxu0 %v3818_v63  ;;  %v3880_v63 = vld [vmem:[#allocation11 + $0x18] sm:$0xff]  }
 0x377   :  { %3427 = vmatprep.subr.bf16.mxu0 %v4302_v2  ;;  %3490 = vmatpush3.bf16.msra.mxu1 %v3844_v34  ;;  %v3875_v34 = vld [vmem:[#allocation9 + $0x270] sm:$0xff]  }
 0x378   :  { %3495 = vmatprep.subr.bf16.mxu1 %v4302_v2 }
 0x37a   :  { %3428 = vmatpush3.bf16.msra.mxu0 %v3819_v1  ;;  %v3849_v1 = vld [vmem:[#allocation9 + $0x160] sm:$0xff]  }
 0x37b   :  { %3429 = vmatprep.subr.bf16.mxu0 %v4302_v2 }
 0x37e   :  { %3430 = vmatpush3.bf16.msra.mxu0 %v3820_v3  ;;  %v3850_v3 = vld [vmem:[#allocation9 + $0x168] sm:$0xff]  }
 0x37f   :  { %3435 = vmatprep.subr.bf16.mxu0 %v4302_v2 }
 0x381   :  { %3432 = vmatmul.mubr.bf16.vlgmr.msra.gmra.mrb[8].mxu0 %v4400_v6 }
 0x382   :  { %3436 = vmatpush3.bf16.msra.mxu0 %v3821_v7  ;;  %3451 = vmatprep.mubr.msk.bf16.mxu0 %vm4082_vm0, %v4302_v2  ;;  %v3851_v7 = vld [vmem:[#allocation9 + $0x170] sm:$0xff]  }
 0x383   :  { %3437 = vmatprep.subr.bf16.mxu0 %v4302_v2 }
 0x386   :  { %3438 = vmatpush3.bf16.msra.mxu0 %v3822_v0  ;;  %v3852_v0 = vld [vmem:[#allocation9 + $0x178] sm:$0xff]  }
 0x387   :  { %3439 = vmatprep.subr.bf16.mxu0 %v4302_v2 }
 0x38a   :  { %3440 = vmatpush3.bf16.msra.mxu0 %v3823_v4  ;;  %v3853_v4 = vld [vmem:[#allocation9 + $0x1c0] sm:$0xff]  }
 0x38b   :  { %3441 = vmatprep.subr.bf16.mxu0 %v4302_v2 }
 0x38e   :  { %3442 = vmatpush3.bf16.msra.mxu0 %v3824_v5  ;;  %v3854_v5 = vld [vmem:[#allocation9 + $0x1c8] sm:$0xff]  }
 0x38f   :  { %3443 = vmatprep.subr.bf16.mxu0 %v4302_v2 }
 0x392   :  { %3444 = vmatpush3.bf16.msra.mxu0 %v3825_v8  ;;  %v3855_v8 = vld [vmem:[#allocation9 + $0x1d0] sm:$0xff]  }
 0x393   :  { %3445 = vmatprep.subr.bf16.mxu0 %v4302_v2 }
 0x396   :  { %3446 = vmatpush3.bf16.msra.mxu0 %v3826_v9  ;;  %v3856_v9 = vld [vmem:[#allocation9 + $0x1d8] sm:$0xff]  }
 0x397   :  { %3447 = vmatprep.subr.bf16.mxu0 %v4302_v2 }
 0x39a   :  { %3448 = vmatpush3.bf16.msra.mxu0 %v3827_v10  ;;  %v3857_v10 = vld [vmem:[#allocation9 + $0x1e0] sm:$0xff]  }
 0x39b   :  { %3449 = vmatprep.subr.bf16.mxu0 %v4302_v2 }
 0x39e   :  { %3450 = vmatpush3.bf16.msra.mxu0 %v3828_v11  ;;  %v3859_v11 = vld [vmem:[#allocation9 + $0x1f0] sm:$0xff]  }
 0x39f   :  { %3455 = vmatprep.subr.bf16.mxu0 %v4302_v2 }
 0x3a1   :  { %3452 = vmatmul.mubr.bf16.vlgmr.msra.gmra.mrb[8].mxu0 %v1328_v15  ;;  %v3861_v15 = vld [vmem:[#allocation9 + $0x200] sm:$0xff]  }
 0x3a2   :  { %3456 = vmatpush3.bf16.msra.mxu0 %v3829_v14  ;;  %3471 = vmatprep.mubr.msk.bf16.mxu0 %vm4082_vm0, %v4302_v2 }
 0x3a3   :  { %3457 = vmatprep.subr.bf16.mxu0 %v4302_v2 }
 0x3a6   :  { %3458 = vmatpush3.bf16.msra.mxu0 %v3830_v16 }
 0x3a7   :  { %3459 = vmatprep.subr.bf16.mxu0 %v4302_v2 }
 0x3aa   :  { %3460 = vmatpush3.bf16.msra.mxu0 %v3831_v18  ;;  %v3862_v18 = vld [vmem:[#allocation9 + $0x208] sm:$0xff]  }
 0x3ab   :  { %3461 = vmatprep.subr.bf16.mxu0 %v4302_v2 }
 0x3ae   :  { %3462 = vmatpush3.bf16.msra.mxu0 %v3832_v19  ;;  %v3863_v19 = vld [vmem:[#allocation9 + $0x210] sm:$0xff]  }
 0x3af   :  { %3463 = vmatprep.subr.bf16.mxu0 %v4302_v2 }
 0x3b2   :  { %3464 = vmatpush3.bf16.msra.mxu0 %v3833_v20  ;;  %v3864_v20 = vld [vmem:[#allocation9 + $0x218] sm:$0xff]  }
 0x3b3   :  { %3465 = vmatprep.subr.bf16.mxu0 %v4302_v2 }
 0x3b6   :  { %3466 = vmatpush3.bf16.msra.mxu0 %v3834_v23  ;;  %v3866_v23 = vld [vmem:[#allocation9 + $0x228] sm:$0xff]  }
 0x3b7   :  { %3467 = vmatprep.subr.bf16.mxu0 %v4302_v2 }
 0x3ba   :  { %3468 = vmatpush3.bf16.msra.mxu0 %v3835_v25  ;;  %v3868_v25 = vld [vmem:[#allocation9 + $0x238] sm:$0xff]  }
 0x3bb   :  { %3469 = vmatprep.subr.bf16.mxu0 %v4302_v2 }
 0x3be   :  { %3470 = vmatpush3.bf16.msra.mxu0 %v3836_v27 }
 0x3bf   :  { %3575 = vmatprep.subr.bf16.mxu0 %v4302_v2 }
 0x3c1   :  { %3472 = vmatmul.mubr.bf16.vlgmr.msra.gmra.mrb[8].mxu0 %v1331_v29  ;;  %v3870_v29 = vld [vmem:[#allocation9 + $0x248] sm:$0xff]  }
 0x3c2   :  { %3591 = vmatprep.mubr.msk.bf16.mxu0 %vm4082_vm0, %v4302_v2  ;;  %3576 = vmatpush3.bf16.msra.mxu0 %v3877_v59 }
 0x3c3   :  { %3577 = vmatprep.subr.bf16.mxu0 %v4302_v2 }
 0x3c6   :  { %3578 = vmatpush3.bf16.msra.mxu0 %v3878_v60 }
 0x3c7   :  { %3579 = vmatprep.subr.bf16.mxu0 %v4302_v2 }
 0x3ca   :  { %3580 = vmatpush3.bf16.msra.mxu0 %v3879_v61 }
 0x3cb   :  { %3581 = vmatprep.subr.bf16.mxu0 %v4302_v2 }
 0x3ce   :  { %3582 = vmatpush3.bf16.msra.mxu0 %v3880_v63 }
 0x3cf   :  { %3583 = vmatprep.subr.bf16.mxu0 %v4302_v2 }
 0x42c   :  { %v1891_v35 = vpop.f32.mrb[4].mxu1 }
 0x42d   :  { %v4434_v36 = vpop.f32.mrb[5].mxu1 }
 0x42e   :  { %v1895_v37 = vpop.f32.mrb[6].mxu1 }
 0x42f   :  { %v4436_v38 = vpop.f32.mrb[7].mxu1 }
 0x494   :  { %v1751_v39 = vpop.f32.mrb[8].mxu0 }
 0x495   :  { %v1900_v41 = vadd.f32 %v1891_v35, %v1751_v39  ;;  %v3473_v42 = vpop.f32.mrb[9].mxu0  ;;  %v3876_v35 = vld [vmem:[#allocation9 + $0x278] sm:$0xff]   ;;  %v3882_v39 = vld [vmem:[#allocation11 + $0x28] sm:$0xff]  }
 0x496   :  { %v1754_v44 = vpop.f32.mrb[10].mxu0  ;;  %v3884_v42 = vld [vmem:[#allocation11 + $0x38] sm:$0xff]  }
 0x497   :  { %v1920_v45 = vmul.f32 %v2969_v40, %v1900_v41  ;;  %v1901_v46 = vadd.f32 %v1895_v37, %v1754_v44  ;;  %v3474_v47 = vpop.f32.mrb[11].mxu0  ;;  %v3881_v37 = vld [vmem:[#allocation11 + $0x20] sm:$0xff]   ;;  %v4493_v41 = vld [vmem:[#allocation2] sm:$0xff] }
 0x498   :  { %3584 = vmatpush3.bf16.msra.mxu0 %v3881_v37  ;;  %v2967_v47 = vld [vmem:[%s4560_s8 + $0x1] ss:$0 sm:$0xff] }
 0x499   :  { %v1930_v48 = vadd.f32 %v2971_v43, %v1920_v45  ;;  %v1921_v49 = vmul.f32 %v2969_v40, %v1901_v46  ;;  %3585 = vmatprep.subr.bf16.mxu0 %v4302_v2  ;;  %v3883_v40 = vld [vmem:[#allocation11 + $0x30] sm:$0xff]  }
 0x49a   :  { %v3015_v45 = vld [vmem:[%s4559_s7 + $0x1] ss:$0 sm:$0xff] }
 0x49b   :  { %v1932_v50 = vmax.f32 %v1930_v48, 0.0  ;;  %v1931_v51 = vadd.f32 %v2971_v43, %v1921_v49  ;;  %v3013_v43 = vld [vmem:[%s4558_s6 + $0x1] ss:$0 sm:$0xff] }
 0x49c   :  { %3586 = vmatpush3.bf16.msra.mxu0 %v3882_v39 }
 0x49d   :  { %1934 = vst [vmem:[#allocation2 + $0x8] sm:$0xff] %v1932_v50  ;;  %v1933_v52 = vmax.f32 %v1931_v51, 0.0  ;;  %3587 = vmatprep.subr.bf16.mxu0 %v4302_v2 }
 0x49f   :  { %1935 = vst [vmem:[#allocation2 + $0x18] sm:$0xff] %v1933_v52  ;;  %v4444_v54 = vpack.c.bf16 %v1933_v52, %v1932_v50  ;;  %v1910_v52 = vadd.f32 %v2967_v47, %v4434_v36  ;;  %v3016_v36 = vld [vmem:[%s4562_s10] ss:$0 sm:$0xff] }
 0x4a0   :  { %3588 = vmatpush3.bf16.msra.mxu0 %v3883_v40 }
 0x4a1   :  { %3589 = vmatprep.subr.bf16.mxu0 %v4493_v41 }
 0x4a4   :  { %v1939_v55 = vld [vmem:[#allocation2 + $0x2] sm:$0xff]  ;;  %3590 = vmatpush3.bf16.msra.mxu0 %v3884_v42 }
 0x4a5   :  { %v1942_v14 = vld [vmem:[#allocation2 + $0x4] sm:$0xff]  ;;  %3595 = vmatprep.subr.bf16.mxu0 %v4493_v41 }
 0x4a6   :  { %v1940_v56 = vld [vmem:[#allocation2 + $0x12] sm:$0xff]  ;;  %v1945_v27 = vld [vmem:[#allocation2 + $0x6] sm:$0xff] }
 0x4a7   :  { %v1941_v58 = vpack.c.bf16 %v1940_v56, %v1939_v55  ;;  %v1943_v13 = vld [vmem:[#allocation2 + $0x14] sm:$0xff]  ;;  %v1911_v56 = vadd.f32 %v2967_v47, %v4436_v38 }
 0x4a8   :  { %v1944_v16 = vpack.c.bf16 %v1943_v13, %v1942_v14  ;;  %v1946_v26 = vld [vmem:[#allocation2 + $0x16] sm:$0xff]  ;;  %v3891_v14 = vld [vmem:[#allocation12 + $0x30] sm:$0xff]  }
 0x4a9   :  { %3492 = vmatmul.mubr.bf16.vlgmr.msra.gmra.mrb[8].mxu1 %v1941_v58  ;;  %v1947_v53 = vpack.c.bf16 %v1946_v26, %v1945_v27  ;;  %v3890_v13 = vld [vmem:[#allocation12 + $0x28] sm:$0xff]  }
 0x4aa   :  { %3496 = vmatpush3.bf16.msra.mxu1 %v3845_v57  ;;  %3511 = vmatprep.mubr.msk.bf16.mxu1 %vm4082_vm0, %v4302_v2 }
 0x4ab   :  { %3497 = vmatprep.subr.bf16.mxu1 %v4302_v2 }
 0x4ae   :  { %3498 = vmatpush3.bf16.msra.mxu1 %v3846_v17 }
 0x4af   :  { %3499 = vmatprep.subr.bf16.mxu1 %v4302_v2 }
 0x4b2   :  { %3500 = vmatpush3.bf16.msra.mxu1 %v3847_v22 }
 0x4b3   :  { %3501 = vmatprep.subr.bf16.mxu1 %v4302_v2 }
 0x4b6   :  { %3502 = vmatpush3.bf16.msra.mxu1 %v3848_v62 }
 0x4b7   :  { %3503 = vmatprep.subr.bf16.mxu1 %v4302_v2 }
 0x4ba   :  { %3504 = vmatpush3.bf16.msra.mxu1 %v3849_v1 }
 0x4bb   :  { %3505 = vmatprep.subr.bf16.mxu1 %v4302_v2 }
 0x4be   :  { %3506 = vmatpush3.bf16.msra.mxu1 %v3850_v3 }
 0x4bf   :  { %3507 = vmatprep.subr.bf16.mxu1 %v4302_v2 }
 0x4c2   :  { %3508 = vmatpush3.bf16.msra.mxu1 %v3851_v7  ;;  %v3025_v7 = vld [vmem:[%s4563_s11] ss:$0 sm:$0xff] }
 0x4c3   :  { %3509 = vmatprep.subr.bf16.mxu1 %v4302_v2 }
 0x4c6   :  { %3510 = vmatpush3.bf16.msra.mxu1 %v3852_v0 }
 0x4c7   :  { %3515 = vmatprep.subr.bf16.mxu1 %v4302_v2 }
 0x4c9   :  { %3512 = vmatmul.mubr.bf16.vlgmr.msra.gmra.mrb[8].mxu1 %v4400_v6  ;;  %v3858_v6 = vld [vmem:[#allocation9 + $0x1e8] sm:$0xff]  }
 0x4ca   :  { %3516 = vmatpush3.bf16.msra.mxu1 %v3853_v4  ;;  %3531 = vmatprep.mubr.msk.bf16.mxu1 %vm4082_vm0, %v4302_v2 }
 0x4cb   :  { %3517 = vmatprep.subr.bf16.mxu1 %v4302_v2 }
 0x4ce   :  { %3518 = vmatpush3.bf16.msra.mxu1 %v3854_v5 }
 0x4cf   :  { %3519 = vmatprep.subr.bf16.mxu1 %v4302_v2 }
 0x4d2   :  { %3520 = vmatpush3.bf16.msra.mxu1 %v3855_v8 }
 0x4d3   :  { %3521 = vmatprep.subr.bf16.mxu1 %v4302_v2 }
 0x4d6   :  { %3522 = vmatpush3.bf16.msra.mxu1 %v3856_v9  ;;  %v3885_v9 = vld [vmem:[#allocation12] sm:$0xff]  }
 0x4d7   :  { %3523 = vmatprep.subr.bf16.mxu1 %v4302_v2 }
 0x4da   :  { %3524 = vmatpush3.bf16.msra.mxu1 %v3857_v10  ;;  %v3886_v10 = vld [vmem:[#allocation12 + $0x8] sm:$0xff]  }
 0x4db   :  { %3525 = vmatprep.subr.bf16.mxu1 %v4302_v2 }
 0x4de   :  { %3526 = vmatpush3.bf16.msra.mxu1 %v3858_v6  ;;  %v3887_v6 = vld [vmem:[#allocation12 + $0x10] sm:$0xff]  }
 0x4df   :  { %3527 = vmatprep.subr.bf16.mxu1 %v4302_v2 }
 0x4e2   :  { %3528 = vmatpush3.bf16.msra.mxu1 %v3859_v11  ;;  %v3888_v11 = vld [vmem:[#allocation12 + $0x18] sm:$0xff]  }
 0x4e3   :  { %3529 = vmatprep.subr.bf16.mxu1 %v4302_v2 }
 0x4e6   :  { %3530 = vmatpush3.bf16.msra.mxu1 %v3860_v12  ;;  %v3889_v12 = vld [vmem:[#allocation12 + $0x20] sm:$0xff]  }
 0x4e7   :  { %3535 = vmatprep.subr.bf16.mxu1 %v4302_v2 }
 0x4e9   :  { %3532 = vmatmul.mubr.bf16.vlgmr.msra.gmra.mrb[8].mxu1 %v1944_v16 }
 0x4ea   :  { %3536 = vmatpush3.bf16.msra.mxu1 %v3861_v15  ;;  %3551 = vmatprep.mubr.msk.bf16.mxu1 %vm4082_vm0, %v4302_v2  ;;  %v3892_v15 = vld [vmem:[#allocation12 + $0x38] sm:$0xff]  }
 0x4eb   :  { %3537 = vmatprep.subr.bf16.mxu1 %v4302_v2 }
 0x4ee   :  { %3538 = vmatpush3.bf16.msra.mxu1 %v3862_v18 }
 0x4ef   :  { %3539 = vmatprep.subr.bf16.mxu1 %v4302_v2 }
 0x4f2   :  { %3540 = vmatpush3.bf16.msra.mxu1 %v3863_v19 }
 0x4f3   :  { %3541 = vmatprep.subr.bf16.mxu1 %v4302_v2 }
 0x4f6   :  { %3542 = vmatpush3.bf16.msra.mxu1 %v3864_v20 }
 0x4f7   :  { %3543 = vmatprep.subr.bf16.mxu1 %v4302_v2 }
 0x4fa   :  { %3544 = vmatpush3.bf16.msra.mxu1 %v3865_v21 }
 0x4fb   :  { %3545 = vmatprep.subr.bf16.mxu1 %v4302_v2 }
 0x4fe   :  { %3546 = vmatpush3.bf16.msra.mxu1 %v3866_v23 }
 0x4ff   :  { %3547 = vmatprep.subr.bf16.mxu1 %v4302_v2 }
 0x502   :  { %3548 = vmatpush3.bf16.msra.mxu1 %v3867_v24 }
 0x503   :  { %3549 = vmatprep.subr.bf16.mxu1 %v4302_v2 }
 0x506   :  { %3550 = vmatpush3.bf16.msra.mxu1 %v3868_v25 }
 0x507   :  { %3555 = vmatprep.subr.bf16.mxu1 %v4302_v2 }
 0x509   :  { %3552 = vmatmul.mubr.bf16.vlgmr.msra.gmra.mrb[8].mxu1 %v1947_v53 }
 0x50a   :  { %3556 = vmatpush3.bf16.msra.mxu1 %v3869_v28  ;;  %3571 = vmatprep.mubr.msk.bf16.mxu1 %vm4082_vm0, %v4302_v2 }
 0x50b   :  { %3557 = vmatprep.subr.bf16.mxu1 %v4302_v2 }
 0x50e   :  { %3558 = vmatpush3.bf16.msra.mxu1 %v3870_v29 }
 0x50f   :  { %3559 = vmatprep.subr.bf16.mxu1 %v4302_v2 }
 0x512   :  { %3560 = vmatpush3.bf16.msra.mxu1 %v3871_v30 }
 0x513   :  { %3561 = vmatprep.subr.bf16.mxu1 %v4302_v2 }
 0x516   :  { %3562 = vmatpush3.bf16.msra.mxu1 %v3872_v31 }
 0x517   :  { %3563 = vmatprep.subr.bf16.mxu1 %v4302_v2 }
 0x51a   :  { %3564 = vmatpush3.bf16.msra.mxu1 %v3873_v32 }
 0x51b   :  { %3565 = vmatprep.subr.bf16.mxu1 %v4302_v2 }
 0x51e   :  { %3566 = vmatpush3.bf16.msra.mxu1 %v3874_v33 }
 0x51f   :  { %3567 = vmatprep.subr.bf16.mxu1 %v4302_v2 }
 0x522   :  { %3568 = vmatpush3.bf16.msra.mxu1 %v3875_v34 }
 0x523   :  { %3569 = vmatprep.subr.bf16.mxu1 %v4302_v2 }
 0x526   :  { %3570 = vmatpush3.bf16.msra.mxu1 %v3876_v35 }
 0x529   :  { %3572 = vmatmul.mubr.bf16.vlgmr.msra.gmra.mrb[8].mxu1 %v4444_v54 }
 0x5fc   :  { %v2474_v44 = vpop.f32.mrb[8].mxu1 }
 0x5fd   :  { %v2491_v2 = vmul.f32 %v3013_v43, %v2474_v44  ;;  %v3573_v46 = vpop.f32.mrb[9].mxu1 }
 0x5fe   :  { %v2477_v48 = vpop.f32.mrb[10].mxu1 }
 0x5ff   :  { %v2501_v49 = vadd.f32 %v3015_v45, %v2491_v2  ;;  %v2492_v50 = vmul.f32 %v3013_v43, %v2477_v48  ;;  %v3574_v51 = vpop.f32.mrb[11].mxu1 }
 0x601   :  { %v2503_v54 = vmax.f32 %v2501_v49, 0.0  ;;  %v2502_v55 = vadd.f32 %v3015_v45, %v2492_v50 }
 0x603   :  { %v4508_v57 = vadd.f32 %v2503_v54, %v1910_v52  ;;  %v2504_v58 = vmax.f32 %v2502_v55, 0.0 }
 0x605   :  { %v4510_v59 = vadd.f32 %v2504_v58, %v1911_v56  ;;  %v2507_v17 = vmax.f32 %v4508_v57, 0.0 }
 0x607   :  { %v2508_v60 = vmax.f32 %v4510_v59, 0.0  ;;  %v3026_v59 = vld [vmem:[%s4565_s13] ss:$0 sm:$0xff] }
 0x609   :  { %v2509_v22 = vpack.c.bf16 %v2508_v60, %v2507_v17 }
 0x60b   :  { %3592 = vmatmul.mubr.bf16.vlgmr.msra.gmra.mrb[12].mxu0 %v2509_v22 }
 0x60c   :  { %3611 = vmatprep.mubr.msk.bf16.mxu0 %vm4082_vm0, %v4493_v41  ;;  %3596 = vmatpush3.bf16.msra.mxu0 %v3885_v9 }
 0x60d   :  { %3597 = vmatprep.subr.bf16.mxu0 %v4493_v41 }
 0x610   :  { %3598 = vmatpush3.bf16.msra.mxu0 %v3886_v10 }
 0x611   :  { %3599 = vmatprep.subr.bf16.mxu0 %v4493_v41 }
 0x614   :  { %3600 = vmatpush3.bf16.msra.mxu0 %v3887_v6 }
 0x615   :  { %3601 = vmatprep.subr.bf16.mxu0 %v4493_v41 }
 0x618   :  { %3602 = vmatpush3.bf16.msra.mxu0 %v3888_v11 }
 0x619   :  { %3603 = vmatprep.subr.bf16.mxu0 %v4493_v41 }
 0x61c   :  { %3604 = vmatpush3.bf16.msra.mxu0 %v3889_v12 }
 0x61d   :  { %3605 = vmatprep.subr.bf16.mxu0 %v4493_v41 }
 0x620   :  { %3606 = vmatpush3.bf16.msra.mxu0 %v3890_v13 }
 0x621   :  { %3607 = vmatprep.subr.bf16.mxu0 %v4493_v41 }
 0x624   :  { %3608 = vmatpush3.bf16.msra.mxu0 %v3891_v14 }
 0x625   :  { %3609 = vmatprep.subr.bf16.mxu0 %v4493_v41 }
 0x628   :  { %3610 = vmatpush3.bf16.msra.mxu0 %v3892_v15 }
 0x6de   :  { %v2615_v38 = vpop.f32.mrb[12].mxu0 }
 0x6df   :  { %v2616_v61 = vadd.f32 %v3016_v36, %v2615_v38  ;;  %v3593_v62 = vpop.f32.mrb[13].mxu0 }
 0x6e0   :  { %v2618_v63 = vpop.f32.mrb[14].mxu0 }
 0x6e1   :  { %3893 = vtanh.f32 %v2616_v61  ;;  %v2619_v1 = vadd.f32 %v3016_v36, %v2618_v63  ;;  %v3594_v3 = vpop.f32.mrb[15].mxu0 }
 0x6e3   :  { %3895 = vtanh.f32 %v2619_v1 }
 0x6eb   :  { %v3894_v0 = vpop.eup %3893 }
 0x6ec   :  { %v2631_v4 = vmul.f32 %v3894_v0, %v3025_v7 }
 0x6ed   :  { %v3896_v5 = vpop.eup %3895 }
 0x6ee   :  { %2633 = vadd.xlane.f32.xlu0 %v2631_v4  ;;  %v2632_v8 = vmul.f32 %v3896_v5, %v3025_v7 }
 0x6f2   :  { %2635 = vadd.xlane.f32.xlu0 %v2632_v8 }
 0x77b   :  { %v2634_v16 = vpop.xlane.xlu0 %2633 }
 0x77c   :  { %v2637_v18 = vrot.slane %v2634_v16, 4 }
 0x77e   :  { %v2638_v19 = vmax.f32 %v2634_v16, %v2637_v18 }
 0x77f   :  { %v2636_v20 = vpop.xlane.xlu0 %2635 }
 0x780   :  { %v2639_v21 = vrot.slane %v2638_v19, 2  ;;  %v2643_v23 = vrot.slane %v2636_v20, 4 }
 0x782   :  { %v2640_v24 = vmax.f32 %v2638_v19, %v2639_v21  ;;  %v2644_v25 = vmax.f32 %v2636_v20, %v2643_v23 }
 0x784   :  { %v2641_v26 = vrot.slane %v2640_v24, 1  ;;  %v2645_v27 = vrot.slane %v2644_v25, 2 }
 0x786   :  { %v2642_v28 = vmax.f32 %v2640_v24, %v2641_v26  ;;  %v2646_v53 = vmax.f32 %v2644_v25, %v2645_v27 }
 0x788   :  { %v2649_v29 = vsub.f32 %v2634_v16, %v2642_v28  ;;  %v2647_v30 = vrot.slane %v2646_v53, 1 }
 0x78a   :  { %v2651_v31 = vmul.f32 1.442695, %v2649_v29  ;;  %v2648_v32 = vmax.f32 %v2646_v53, %v2647_v30 }
 0x78c   :  { %3897 = vpow2.f32 %v2651_v31  ;;  %v2650_v33 = vsub.f32 %v2636_v20, %v2648_v32 }
 0x78e   :  { %v2653_v34 = vmul.f32 1.442695, %v2650_v33 }
 0x790   :  { %3899 = vpow2.f32 %v2653_v34 }
 0x796   :  { %v3898_v35 = vpop.eup %3897 }
 0x797   :  { %v2655_v37 = vrot.slane %v3898_v35, 4 }
 0x799   :  { %v2656_v39 = vadd.f32 %v3898_v35, %v2655_v37 }
 0x79a   :  { %v3900_v40 = vpop.eup %3899 }
 0x79b   :  { %v2657_v41 = vrot.slane %v2656_v39, 2  ;;  %v2661_v42 = vrot.slane %v3900_v40, 4 }
 0x79d   :  { %v2658_v43 = vadd.f32 %v2657_v41, %v2656_v39  ;;  %v2662_v44 = vadd.f32 %v3900_v40, %v2661_v42 }
 0x79f   :  { %v2659_v45 = vrot.slane %v2658_v43, 1  ;;  %v2663_v2 = vrot.slane %v2662_v44, 2 }
 0x7a1   :  { %v2664_v46 = vadd.f32 %v2663_v2, %v2662_v44  ;;  %v2660_v47 = vadd.f32 %v2659_v45, %v2658_v43 }
 0x7a3   :  { %v2665_v48 = vrot.slane %v2664_v46, 1  ;;  %3901 = vrcp.f32 %v2660_v47 }
 0x7a5   :  { %v2666_v49 = vadd.f32 %v2665_v48, %v2664_v46 }
 0x7a7   :  { %3903 = vrcp.f32 %v2666_v49 }
 0x7ad   :  { %v3902_v50 = vpop.eup %3901 }
 0x7ae   :  { %v2668_v51 = vmul.f32 %v3902_v50, %v3898_v35 }
 0x7b0   :  { %v2671_v52 = vmul.f32 %v2668_v51, %v2507_v17 }
 0x7b1   :  { %v3904_v54 = vpop.eup %3903 }
 0x7b2   :  { %v2670_v55 = vmul.f32 %v3904_v54, %v3900_v40  ;;  %v2673_v56 = vrot.slane %v2671_v52, 4 }
 0x7b4   :  { %v2672_v58 = vmul.f32 %v2670_v55, %v2508_v60  ;;  %v2674_v22 = vadd.f32 %v2673_v56, %v2671_v52 }
 0x7b6   :  { %v2675_v36 = vrot.slane %v2674_v22, 2  ;;  %v2679_v38 = vrot.slane %v2672_v58, 4 }
 0x7b8   :  { %v2676_v61 = vadd.f32 %v2675_v36, %v2674_v22  ;;  %v2680_v62 = vadd.f32 %v2679_v38, %v2672_v58 }
 0x7ba   :  { %v2677_v63 = vrot.slane %v2676_v61, 1  ;;  %v2681_v1 = vrot.slane %v2680_v62, 2 }
 0x7bc   :  { %v2678_v3 = vadd.f32 %v2677_v63, %v2676_v61  ;;  %v2682_v7 = vadd.f32 %v2681_v1, %v2680_v62 }
 0x7be   :  { %v2683_v0 = vrot.slane %v2682_v7, 1  ;;  %v2685_v5 = vpack.c.bf16 %v2678_v3, %v2678_v3 }
 0x7c0   :  { %v2684_v4 = vadd.f32 %v2683_v0, %v2682_v7  ;;  %v2712_v17 = vunpack.c.l.b16 %v2685_v5 }
 0x7c2   :  { %v2686_v57 = vpack.c.bf16 %v2684_v4, %v2684_v4 }
 0x7c4   :  { %v2713_v8 = vunpack.c.l.b16 %v2686_v57 }
 0x7c6   :  { %v2715_v9 = vsel %vm2714_vm1, %v2713_v8, %v2712_v17 }
 0x7c7   :  { %v2716_v10 = vpack.c.b16 %v2715_v9, %v2715_v9 }
 0x7c9   :  { %3612 = vmatmul.mubr.bf16.vlgmr.msra.gmra.mrb[16].mxu0 %v2716_v10 }
 0x89c   :  { %v2800_v60 = vpop.f32.mrb[16].mxu0 }
 0x89d   :  { %v2801_v6 = vadd.f32 %v3026_v59, %v2800_v60  ;;  %v3613_v11 = vpop.f32.mrb[17].mxu0 }
 0x89e   :  { %v2803_v12 = vpop.f32.mrb[18].mxu0 }
 0x89f   :  { %2806 = vst [vmem:[#allocation14] sm:$0x3] %v2801_v6  ;;  %v3614_v13 = vpop.f32.mrb[19].mxu0 }
 0x8a0   :  { %4050 = shalt.err (!%p4047_p10)
}
 0x8a1   :  { %s4051_s13 = scalar_lea.hbm %s4566_s14, 32 }
 0x8a2   :  { %p4052_p11 = scmp.ne.s32.totalorder %s4566_s14, %s4051_s13  ;;  %p4055_p12 = scmp.lt.u32.totalorder %s4051_s13, %s4566_s14 }
 0x8a4   :  { %p4057_p13 = pnand %p4055_p12, %p4052_p11 }
 0x8a6   :  { %4060 = shalt.err (!%p4057_p13)
}
 0x8a7   :  { %2816 = dma.vmem_to_hbm [thread:$0]  %s2814_s9, 32, %s4566_s14, [#allocation5]  }
 0x8a8   :  { %4069 = dma.done.wait [#allocation5], 32  }
 0x8a9   :  { %4070 = vsyncadd [#allocation5], 4294967264 }
 0x8aa   :  { %2820 = vsyncpa [#allocation4], 1 }
 0x8ab   :  { %2821 = vsyncpa [#allocation7], 1 }
 0x8ac   :  { %2822 = vsyncpa [#allocation10], 1 }
 0x8ad   :  { %2823 = vsyncpa [#allocation13], 1 }
 0x8ae   :  { %2824 = vsyncpa [#allocation5], 1 }

</bundles_post_ra>
